<compile_context>
chip_gen: v7x
topology: tpu7x:2x2x1
jax: 0.10.0
libtpu: 0.0.40
codegen_flags: <defaults>
</compile_context>

<pallas_src>
import jax
import jax.numpy as jnp
import numpy as np
from jax.experimental import pallas as pl
from jax.experimental.pallas import tpu as pltpu

HIDDEN = 32                        # hidden_size of Linear(51, hidden_size)
NUM_FREQ = 8                       # 2.0 ** arange(8)
FOUR_FEAT = 3 * NUM_FREQ           # 24 fourier products per point
IN_FEAT = 3 + 2 * FOUR_FEAT        # 51
TM_MAX = 2048                      # row-tile upper bound (safe on v5e/v6e/v7x)


def _round_up(x, m):
    return (x + m - 1) // m * m


def _freq_matrix():
    """(3, 24) block-diagonal matrix F so that pts @ F reproduces the PyTorch
    ordering [p0*f0..p0*f7, p1*f0..p1*f7, p2*f0..p2*f7]."""
    freqs = 2.0 ** np.arange(NUM_FREQ, dtype=np.float32)
    f = np.zeros((3, FOUR_FEAT), dtype=np.float32)
    for c in range(3):
        f[c, c * NUM_FREQ:(c + 1) * NUM_FREQ] = freqs
    return f


def fourier_encoder_kernel(pts_ref, f_ref, w_pts_ref, w_sin_ref, w_cos_ref,
                           b_ref, out_ref):
    """One row tile: fourier featurization + linear projection.

    pts_ref   : (TM, 3)   f32 point coordinates
    f_ref     : (3, 24)   f32 block-diagonal frequency matrix
    w_pts_ref : (3, H)    f32 rows 0:3   of W^T
    w_sin_ref : (24, H)   f32 rows 3:27  of W^T
    w_cos_ref : (24, H)   f32 rows 27:51 of W^T
    b_ref     : (1, H)    f32 bias
    out_ref   : (TM, H)   f32
    """
    pts = pts_ref[...]                                              # (TM, 3)

    # All coordinate*frequency products in one MXU call: (TM, 24).
    m = jnp.dot(pts, f_ref[...], preferred_element_type=jnp.float32)

    # Projection with pre-split W^T: never materialize the (TM, 51) concat.
    acc = jnp.dot(pts, w_pts_ref[...], preferred_element_type=jnp.float32)
    acc += jnp.dot(jnp.sin(m), w_sin_ref[...],
                   preferred_element_type=jnp.float32)
    acc += jnp.dot(jnp.cos(m), w_cos_ref[...],
                   preferred_element_type=jnp.float32)
    out_ref[...] = acc + b_ref[...]


def fourier_point_encoder(points, weight_t, bias, *, tm_max=TM_MAX):
    """points: (..., 3) f32; weight_t: (51, H) = W^T; bias: (H,)."""
    *lead, c = points.shape
    assert c == 3
    hidden = weight_t.shape[1]
    M = int(np.prod(lead)) if lead else 1

    # Row tile: as large as possible up to tm_max, sublane-aligned (x8).
    tm = min(tm_max, _round_up(M, 8))
    m_pad = _round_up(M, tm)

    pts_flat = points.reshape(M, 3).astype(jnp.float32)
    if m_pad != M:
        pts_flat = jnp.pad(pts_flat, ((0, m_pad - M), (0, 0)))

    f_mat = jnp.asarray(_freq_matrix())                       # (3, 24)
    w_pts = weight_t[:3].astype(jnp.float32)                  # (3, H)
    w_sin = weight_t[3:3 + FOUR_FEAT].astype(jnp.float32)     # (24, H)
    w_cos = weight_t[3 + FOUR_FEAT:].astype(jnp.float32)      # (24, H)
    b_2d = bias.reshape(1, hidden).astype(jnp.float32)

    out = pl.pallas_call(
        fourier_encoder_kernel,
        out_shape=jax.ShapeDtypeStruct((m_pad, hidden), jnp.float32),
        grid_spec=pltpu.PrefetchScalarGridSpec(
            num_scalar_prefetch=0,
            grid=(m_pad // tm,),
            in_specs=[
                pl.BlockSpec((tm, 3), lambda i: (i, 0)),
                pl.BlockSpec((3, FOUR_FEAT), lambda i: (0, 0)),
                pl.BlockSpec((3, hidden), lambda i: (0, 0)),
                pl.BlockSpec((FOUR_FEAT, hidden), lambda i: (0, 0)),
                pl.BlockSpec((FOUR_FEAT, hidden), lambda i: (0, 0)),
                pl.BlockSpec((1, hidden), lambda i: (0, 0)),
            ],
            out_specs=pl.BlockSpec((tm, hidden), lambda i: (i, 0)),
        ),
        compiler_params=pltpu.CompilerParams(
            dimension_semantics=("parallel",),
        ),
    )(pts_flat, f_mat, w_pts, w_sin, w_cos, b_2d)

    return out[:M].reshape(*lead, hidden)


def reference(points, weight_t, bias, frequencies):
    """Pure-JAX reference matching the PyTorch forward exactly."""
    x_mult = (points[..., None] * frequencies).reshape(*points.shape[:-1], -1)
    x_combined = jnp.concatenate(
        [points, jnp.sin(x_mult), jnp.cos(x_mult)], axis=-1
    )
    return x_combined @ weight_t + bias


if __name__ == "__main__":
    key = jax.random.PRNGKey(0)
    k_pts, k_pts2, k_w, k_b = jax.random.split(key, 4)

    # Deterministic synthetic parameters (shapes from nn.Linear(51, hidden)),
    # stored pre-transposed as (51, H) so the kernel does x @ W^T directly.
    bound = 1.0 / np.sqrt(IN_FEAT)
    weight_t = jax.random.uniform(
        k_w, (IN_FEAT, HIDDEN), dtype=jnp.float32, minval=-bound, maxval=bound
    )
    bias = jax.random.uniform(
        k_b, (HIDDEN,), dtype=jnp.float32, minval=-bound, maxval=bound
    )
    frequencies = 2.0 ** jnp.arange(NUM_FREQ, dtype=jnp.float32)

    # Case 1: tile-aligned row count.
    B, N = 2, 64
    points = jax.random.normal(k_pts, (B, N, 3), dtype=jnp.float32)
    out = jax.block_until_ready(
        fourier_point_encoder(points, weight_t, bias)
    )
    ref = reference(points, weight_t, bias, frequencies)
    assert out.shape == (B, N, HIDDEN)
    np.testing.assert_allclose(np.asarray(out), np.asarray(ref),
                               rtol=1e-5, atol=1e-4)

    # Case 2: row count NOT a multiple of the tile (exercises padded tail).
    B2, N2 = 1, 53
    points2 = jax.random.normal(k_pts2, (B2, N2, 3), dtype=jnp.float32)
    out2 = jax.block_until_ready(
        fourier_point_encoder(points2, weight_t, bias)
    )
    ref2 = reference(points2, weight_t, bias, frequencies)
    assert out2.shape == (B2, N2, HIDDEN)
    np.testing.assert_allclose(np.asarray(out2), np.asarray(ref2),
                               rtol=1e-5, atol=1e-4)

    print("KERNEL_OK")
</pallas_src>

<mosaic_0001>
module attributes {stable_mosaic.version = 11 : i64} {
  func.func @fourier_encoder_kernel(%arg0: i32, %arg1: memref<128x3xf32, #tpu.memory_space<vmem>>, %arg2: memref<3x24xf32, #tpu.memory_space<vmem>>, %arg3: memref<3x32xf32, #tpu.memory_space<vmem>>, %arg4: memref<24x32xf32, #tpu.memory_space<vmem>>, %arg5: memref<24x32xf32, #tpu.memory_space<vmem>>, %arg6: memref<1x32xf32, #tpu.memory_space<vmem>>, %arg7: memref<128x32xf32, #tpu.memory_space<vmem>>) attributes {dimension_semantics = [#tpu.dimension_semantics<parallel>], iteration_bounds = array<i64: 1>, scalar_prefetch = 0 : i64, scratch_operands = 0 : i64, tpu.core_type = #tpu.core_type<tc>, window_params = [{transform_indices = @transform_0, window_bounds = array<i64: 128, 3>}, {pipeline_mode = #tpu.pipeline_mode<synchronous>, transform_indices = @transform_1, window_bounds = array<i64: 3, 24>}, {pipeline_mode = #tpu.pipeline_mode<synchronous>, transform_indices = @transform_2, window_bounds = array<i64: 3, 32>}, {pipeline_mode = #tpu.pipeline_mode<synchronous>, transform_indices = @transform_3, window_bounds = array<i64: 24, 32>}, {pipeline_mode = #tpu.pipeline_mode<synchronous>, transform_indices = @transform_4, window_bounds = array<i64: 24, 32>}, {pipeline_mode = #tpu.pipeline_mode<synchronous>, transform_indices = @transform_5, window_bounds = array<i64: 1, 32>}, {transform_indices = @transform_6, window_bounds = array<i64: 128, 32>}]} {
    %c0 = arith.constant 0 : index
    %c0_0 = arith.constant 0 : index
    %0 = vector.load %arg1[%c0, %c0_0] : memref<128x3xf32, #tpu.memory_space<vmem>>, vector<128x3xf32>
    %c0_1 = arith.constant 0 : index
    %c0_2 = arith.constant 0 : index
    %1 = vector.load %arg2[%c0_1, %c0_2] : memref<3x24xf32, #tpu.memory_space<vmem>>, vector<3x24xf32>
    %cst = arith.constant dense<0.000000e+00> : vector<128x24xf32>
    %2 = tpu.matmul %0, %1, %cst {dimension_numbers = #tpu.dot_dimension_numbers<[1], [0], [0], [1], [0, 0, 1, 1], [], []>} : vector<128x3xf32>, vector<3x24xf32>, vector<128x24xf32> -> vector<128x24xf32>
    %c0_3 = arith.constant 0 : index
    %c0_4 = arith.constant 0 : index
    %3 = vector.load %arg3[%c0_3, %c0_4] : memref<3x32xf32, #tpu.memory_space<vmem>>, vector<3x32xf32>
    %cst_5 = arith.constant dense<0.000000e+00> : vector<128x32xf32>
    %4 = tpu.matmul %0, %3, %cst_5 {dimension_numbers = #tpu.dot_dimension_numbers<[1], [0], [0], [1], [0, 0, 1, 1], [], []>} : vector<128x3xf32>, vector<3x32xf32>, vector<128x32xf32> -> vector<128x32xf32>
    %5 = math.sin %2 : vector<128x24xf32>
    %c0_6 = arith.constant 0 : index
    %c0_7 = arith.constant 0 : index
    %6 = vector.load %arg4[%c0_6, %c0_7] : memref<24x32xf32, #tpu.memory_space<vmem>>, vector<24x32xf32>
    %cst_8 = arith.constant dense<0.000000e+00> : vector<128x32xf32>
    %7 = tpu.matmul %5, %6, %cst_8 {dimension_numbers = #tpu.dot_dimension_numbers<[1], [0], [0], [1], [0, 0, 1, 1], [], []>} : vector<128x24xf32>, vector<24x32xf32>, vector<128x32xf32> -> vector<128x32xf32>
    %8 = arith.addf %4, %7 : vector<128x32xf32>
    %9 = math.cos %2 : vector<128x24xf32>
    %c0_9 = arith.constant 0 : index
    %c0_10 = arith.constant 0 : index
    %10 = vector.load %arg5[%c0_9, %c0_10] : memref<24x32xf32, #tpu.memory_space<vmem>>, vector<24x32xf32>
    %cst_11 = arith.constant dense<0.000000e+00> : vector<128x32xf32>
    %11 = tpu.matmul %9, %10, %cst_11 {dimension_numbers = #tpu.dot_dimension_numbers<[1], [0], [0], [1], [0, 0, 1, 1], [], []>} : vector<128x24xf32>, vector<24x32xf32>, vector<128x32xf32> -> vector<128x32xf32>
    %12 = arith.addf %8, %11 : vector<128x32xf32>
    %c0_12 = arith.constant 0 : index
    %c0_13 = arith.constant 0 : index
    %13 = vector.load %arg6[%c0_12, %c0_13] : memref<1x32xf32, #tpu.memory_space<vmem>>, vector<1x32xf32>
    %14 = vector.broadcast %13 : vector<1x32xf32> to vector<128x32xf32>
    %15 = arith.addf %12, %14 : vector<128x32xf32>
    %c0_14 = arith.constant 0 : index
    %c0_15 = arith.constant 0 : index
    %16 = vector.load %arg7[%c0_14, %c0_15] : memref<128x32xf32, #tpu.memory_space<vmem>>, vector<128x32xf32>
    tpu.vector_store %arg7[%c0_14, %c0_15], %15 {strides = array<i32>} : memref<128x32xf32, #tpu.memory_space<vmem>>, vector<128x32xf32>,
    return
  }
  func.func @transform_0(%arg0: i32) -> (i32, i32) {
    %c0_i32 = arith.constant 0 : i32
    %c0_i32_0 = arith.constant 0 : i32
    return %arg0, %c0_i32 : i32, i32
  }
  func.func @transform_1(%arg0: i32) -> (i32, i32) {
    %c0_i32 = arith.constant 0 : i32
    %c0_i32_0 = arith.constant 0 : i32
    %c0_i32_1 = arith.constant 0 : i32
    return %c0_i32, %c0_i32_0 : i32, i32
  }
  func.func @transform_2(%arg0: i32) -> (i32, i32) {
    %c0_i32 = arith.constant 0 : i32
    %c0_i32_0 = arith.constant 0 : i32
    %c0_i32_1 = arith.constant 0 : i32
    return %c0_i32, %c0_i32_0 : i32, i32
  }
  func.func @transform_3(%arg0: i32) -> (i32, i32) {
    %c0_i32 = arith.constant 0 : i32
    %c0_i32_0 = arith.constant 0 : i32
    %c0_i32_1 = arith.constant 0 : i32
    return %c0_i32, %c0_i32_0 : i32, i32
  }
  func.func @transform_4(%arg0: i32) -> (i32, i32) {
    %c0_i32 = arith.constant 0 : i32
    %c0_i32_0 = arith.constant 0 : i32
    %c0_i32_1 = arith.constant 0 : i32
    return %c0_i32, %c0_i32_0 : i32, i32
  }
  func.func @transform_5(%arg0: i32) -> (i32, i32) {
    %c0_i32 = arith.constant 0 : i32
    %c0_i32_0 = arith.constant 0 : i32
    %c0_i32_1 = arith.constant 0 : i32
    return %c0_i32, %c0_i32_0 : i32, i32
  }
  func.func @transform_6(%arg0: i32) -> (i32, i32) {
    %c0_i32 = arith.constant 0 : i32
    %c0_i32_0 = arith.constant 0 : i32
    return %arg0, %c0_i32 : i32, i32
  }
}

</mosaic_0001>

<bundles_post_ra>
// kernel: tpu_custom_call.1
= control target key start
LH: loop header
LB: loop body
LE: loop exit
PB: predicated region body
PF: predicated region fallthrough
CT: control target
= control target key end

     0   :  { %vm89_vm0 = vcmask 1042432   ;;  %vm40_vm1 = vcmask 23552   ;;  %v6610_v50 = vmov 683565275   ;;  %v6608_v55 = vmov 2475754826   ;;  %s6598_s1 = inlined_call_operand.vmem [shape: f32[3,24], index: 1, kind: input, shape index: {}]   ;;  %s6599_s0 = inlined_call_operand.vmem [shape: f32[128,3], index: 0, kind: input, shape index: {}]   ;;  %s6600_s2 = inlined_call_operand.vmem [shape: f32[3,32], index: 2, kind: input, shape index: {}]   ;;  %s6601_s3 = inlined_call_operand.vmem [shape: f32[24,32], index: 3, kind: input, shape index: {}]   ;;  %s6602_s4 = inlined_call_operand.vmem [shape: f32[24,32], index: 4, kind: input, shape index: {}]   ;;  %s6603_s5 = inlined_call_operand.vmem [shape: f32[1,32], index: 5, kind: input, shape index: {}]   ;;  %s6604_s6 = inlined_call_operand.vmem [shape: f32[128,32], index: 6, kind: output, shape index: {}]  }
   0x1   :  { %v39_v0 = vld [vmem:[%s6598_s1] sm:$0x7]  ;;  %v24_v2 = vld [vmem:[%s6599_s0 + $0x8] sm:$0xff]  ;;  %v25_v3 = vld [vmem:[%s6599_s0 + $0x10] sm:$0xff]  ;;  %v6614_v57 = vmov 2131351028  }
   0x2   :  { %v23_v1 = vld [vmem:[%s6599_s0] sm:$0xff]  ;;  %4419 = vmatprep.subr.msk.mxu0 %vm89_vm0, %v39_v0  ;;  %v26_v4 = vld [vmem:[%s6599_s0 + $0x18] sm:$0xff]  ;;  %v28_v6 = vld [vmem:[%s6599_s0 + $0x28] sm:$0xff]  ;;  %v6612_v59 = vmov 2102212464  }
   0x3   :  { %4421 = vmatprep.mubr.msk.f32.mxu0 %vm40_vm1, %v23_v1  ;;  %4420 = vmatpush3.msk.msra.mxu0 %vm89_vm0, %v39_v0  ;;  %v27_v5 = vld [vmem:[%s6599_s0 + $0x20] sm:$0xff]  ;;  %v29_v7 = vld [vmem:[%s6599_s0 + $0x30] sm:$0xff]  ;;  %v30_v8 = vld [vmem:[%s6599_s0 + $0x38] sm:$0xff]  ;;  %v6628_v61 = vmov 920167782  }
   0x4   :  { %4477 = vmatprep.mubr.msk.f32.mxu1 %vm40_vm1, %v23_v1  ;;  %4422 = vmatmul.mubr.msk.f32.vlgmr.msra.gmra.mrb[0].mxu0 %vm40_vm1, %v24_v2  ;;  %v31_v9 = vld [vmem:[%s6599_s0 + $0x40] sm:$0xff]  ;;  %v32_v10 = vld [vmem:[%s6599_s0 + $0x48] sm:$0xff]  ;;  %v33_v11 = vld [vmem:[%s6599_s0 + $0x50] sm:$0xff] }
   0x5   :  { %4424 = vmatprep.mubr.msk.f32.mxu0 %vm40_vm1, %v25_v3  ;;  %v34_v12 = vld [vmem:[%s6599_s0 + $0x58] sm:$0xff]  ;;  %v35_v13 = vld [vmem:[%s6599_s0 + $0x60] sm:$0xff]  ;;  %v36_v14 = vld [vmem:[%s6599_s0 + $0x68] sm:$0xff] }
   0x6   :  { %v37_v15 = vld [vmem:[%s6599_s0 + $0x70] sm:$0xff]  ;;  %v38_v16 = vld [vmem:[%s6599_s0 + $0x78] sm:$0xff] }
   0x8   :  { %4425 = vmatmul.mubr.msk.f32.gmra.mrb[2].mxu0 %vm40_vm1, %v26_v4  ;;  %v6618_v4 = vmov 1326507024  }
   0x9   :  { %4427 = vmatprep.mubr.msk.f32.mxu0 %vm40_vm1, %v27_v5 }
   0xc   :  { %4428 = vmatmul.mubr.msk.f32.gmra.mrb[4].mxu0 %vm40_vm1, %v28_v6 }
   0xd   :  { %4430 = vmatprep.mubr.msk.f32.mxu0 %vm40_vm1, %v29_v7 }
  0x10   :  { %4431 = vmatmul.mubr.msk.f32.gmra.mrb[6].mxu0 %vm40_vm1, %v30_v8 }
  0x11   :  { %4433 = vmatprep.mubr.msk.f32.mxu0 %vm40_vm1, %v31_v9 }
  0x14   :  { %4434 = vmatmul.mubr.msk.f32.gmra.mrb[8].mxu0 %vm40_vm1, %v32_v10 }
  0x15   :  { %4436 = vmatprep.mubr.msk.f32.mxu0 %vm40_vm1, %v33_v11 }
  0x18   :  { %4437 = vmatmul.mubr.msk.f32.gmra.mrb[10].mxu0 %vm40_vm1, %v34_v12 }
  0x19   :  { %4439 = vmatprep.mubr.msk.f32.mxu0 %vm40_vm1, %v35_v13 }
  0x1c   :  { %4440 = vmatmul.mubr.msk.f32.gmra.mrb[12].mxu0 %vm40_vm1, %v36_v14 }
  0x1d   :  { %4442 = vmatprep.mubr.msk.f32.mxu0 %vm40_vm1, %v37_v15 }
  0x20   :  { %4443 = vmatmul.mubr.msk.f32.gmra.mrb[14].mxu0 %vm40_vm1, %v38_v16 }
  0xd7   :  { %v4831_v17 = vpop.f32.mrb[0].mxu0 }
  0xd8   :  { %v343_v18 = vand.u32 2147483647, %v4831_v17  ;;  %v346_v19 = vand.u32 2139095040, %v4831_v17  ;;  %v4835_v20 = vpop.f32.mrb[1].mxu0 }
  0xd9   :  { %v239_v21 = vand.u32 2147483647, %v4835_v20  ;;  %v242_v22 = vand.u32 2139095040, %v4835_v20 }
  0xda   :  { %v347_v23 = vshrl.u32 %v346_v19, 23  ;;  %v350_v24 = vand.u32 8388607, %v343_v18 }
  0xdb   :  { %v243_v25 = vshrl.u32 %v242_v22, 23  ;;  %v246_v26 = vand.u32 8388607, %v239_v21  ;;  %v4843_v27 = vpop.f32.mrb[2].mxu0 }
  0xdc   :  { %6663 = vst [vmem:[#allocation2_spill] sm:$0xff] %v4843_v27  ;;  %v4173_v28 = vadd.s32 4294967169, %v347_v23  ;;  %v4845_v29 = vpop.f32.mrb[3].mxu0  ;;  %v554_v31 = vand.u32 2139095040, %v4843_v27  ;;  %v351_v33 = vor.u32 8388608, %v350_v24 }
  0xdd   :  { %6664 = vst [vmem:[#allocation3_spill] sm:$0xff] %v4845_v29  ;;  %v4169_v30 = vadd.s32 4294967169, %v243_v25  ;;  %v247_v34 = vor.u32 8388608, %v246_v26  ;;  %v551_v47 = vand.u32 2147483647, %v4843_v27 }
  0xde   :  { %v353_v32 = vadd.s32 1, %v4173_v28  ;;  %v555_v36 = vshrl.u32 %v554_v31, 23  ;;  %v4852_v44 = vshll.u32 %v351_v33, 8 }
  0xdf   :  { %v249_v35 = vadd.s32 1, %v4169_v30  ;;  %v4848_v37 = vpop.f32.mrb[4].mxu0  ;;  %v4856_v46 = vshll.u32 %v247_v34, 8 }
  0xe0   :  { %6665 = vst [vmem:[#allocation4_spill] sm:$0xff] %v4848_v37  ;;  %vm354_vm2 = vcmp.gt.s32.totalorder %v353_v32, 0  ;;  %v4850_v38 = vpop.f32.mrb[5].mxu0  ;;  %v4181_v40 = vadd.s32 4294967169, %v555_v36 }
  0xe1   :  { %v355_v39 = vsel %vm354_vm2, %v353_v32, 0  ;;  %vm250_vm3 = vcmp.gt.s32.totalorder %v249_v35, 0 }
  0xe2   :  { %v356_v41 = vshrl.u32 %v355_v39, 5  ;;  %v357_v42 = vand.u32 31, %v355_v39  ;;  %v251_v43 = vsel %vm250_vm3, %v249_v35, 0  ;;  %v4862_v53 = vadd.s32 1, %v4181_v40 }
  0xe3   :  { %v4854_v45 = vshrl.u32 %v251_v43, 5  ;;  %v4859_v48 = vpop.f32.mrb[6].mxu0  ;;  %v253_v52 = vand.u32 31, %v251_v43 }
  0xe4   :  { %6666 = vst [vmem:[#allocation5_spill] sm:$0xff] %v4859_v48  ;;  %v358_v49 = vsub.s32 32, %v357_v42  ;;  %v360_v51 = vshll.u32 %v6610_v50, %v357_v42  ;;  %v4864_v54 = vpop.f32.mrb[7].mxu0  ;;  %v363_v56 = vshll.u32 %v6608_v55, %v357_v42  ;;  %v366_v58 = vshll.u32 %v6614_v57, %v357_v42 }
  0xe5   :  { %v369_v60 = vshll.u32 %v6612_v59, %v357_v42  ;;  %v372_v62 = vshll.u32 %v6628_v61, %v357_v42  ;;  %vm375_vm4 = vcmp.lt.s32.totalorder %v356_v41, 1  ;;  %vm376_vm5 = vcmp.lt.s32.totalorder %v356_v41, 2 }
  0xe6   :  { %v361_v63 = vshrl.u32 %v6608_v55, %v358_v49  ;;  %v364_v0 = vshrl.u32 %v6614_v57, %v358_v49  ;;  %v367_v1 = vshrl.u32 %v6612_v59, %v358_v49  ;;  %v359_v2 = vshrl.u32 %v6610_v50, %v358_v49 }
  0xe7   :  { %v370_v3 = vshrl.u32 %v6628_v61, %v358_v49  ;;  %v373_v5 = vshrl.u32 %v6618_v4, %v358_v49  ;;  %v4876_v6 = vpop.f32.mrb[8].mxu0  ;;  %v254_v10 = vsub.s32 32, %v253_v52  ;;  %vm377_vm6 = vcmp.lt.s32.totalorder %v356_v41, 3 }
  0xe8   :  { %6667 = vst [vmem:[#allocation6_spill] sm:$0xff] %v4876_v6  ;;  %v362_v7 = vor.u32 %v361_v63, %v360_v51  ;;  %v365_v8 = vor.u32 %v364_v0, %v363_v56  ;;  %v368_v9 = vor.u32 %v367_v1, %v366_v58  ;;  %vm378_vm7 = vcmp.lt.s32.totalorder %v356_v41, 4 }
  0xe9   :  { %v371_v11 = vor.u32 %v370_v3, %v369_v60  ;;  %v374_v12 = vor.u32 %v373_v5, %v372_v62  ;;  %v256_v24 = vshll.u32 %v6610_v50, %v253_v52  ;;  %v257_v28 = vshrl.u32 %v6608_v55, %v254_v10 }
  0xea   :  { %v379_v13 = vsel %vm375_vm4, %v359_v2, %v362_v7  ;;  %v380_v14 = vsel %vm378_vm7, %v368_v9, 2102212464  ;;  %v383_v15 = vsel %vm375_vm4, %v362_v7, %v365_v8  ;;  %v387_v16 = vsel %vm375_vm4, %v365_v8, %v368_v9 }
  0xeb   :  { %v381_v19 = vsel %vm377_vm6, %v365_v8, %v380_v14  ;;  %v384_v22 = vsel %vm378_vm7, %v371_v11, 920167782  ;;  %v388_v23 = vsel %vm378_vm7, %v374_v12, 1326507024  ;;  %v259_v30 = vshll.u32 %v6608_v55, %v253_v52 }
  0xec   :  { %v385_v25 = vsel %vm377_vm6, %v368_v9, %v384_v22  ;;  %v389_v26 = vsel %vm377_vm6, %v371_v11, %v388_v23  ;;  %v382_v31 = vsel %vm376_vm5, %v379_v13, %v381_v19  ;;  %v260_v34 = vshrl.u32 %v6614_v57, %v254_v10 }
  0xed   :  { %v386_v32 = vsel %vm376_vm5, %v383_v15, %v385_v25  ;;  %v390_v33 = vsel %vm376_vm5, %v387_v16, %v389_v26  ;;  %v258_v42 = vor.u32 %v257_v28, %v256_v24  ;;  %v262_v49 = vshll.u32 %v6614_v57, %v253_v52 }
  0xee   :  { %v4889_v35 = vmul.u32.u64.low %v4852_v44, %v390_v33  ;;  %v4890_v36 = vmul.u32.u64.high %v4852_v44, %v390_v33, %v4889_v35  ;;  %v4893_v39 = vmul.u32.u64.low %v4852_v44, %v386_v32  ;;  %v4894_v40 = vmul.u32.u64.high %v4852_v44, %v386_v32, %v4893_v39 }
  0xef   :  { %v261_v43 = vor.u32 %v260_v34, %v259_v30  ;;  %v263_v51 = vshrl.u32 %v6612_v59, %v254_v10  ;;  %v255_v41 = vshrl.u32 %v6610_v50, %v254_v10  ;;  %v265_v56 = vshll.u32 %v6612_v59, %v253_v52 }
  0xf0   :  { %v266_v58 = vshrl.u32 %v6628_v61, %v254_v10  ;;  %v269_v60 = vshrl.u32 %v6618_v4, %v254_v10  ;;  %v398_v62 = vmul.u32 %v4852_v44, %v382_v31  ;;  %v268_v0 = vshll.u32 %v6628_v61, %v253_v52 }
  0xf1   :  { %v264_v63 = vor.u32 %v263_v51, %v262_v49  ;;  %vm271_vm8 = vcmp.lt.s32.totalorder %v4854_v45, 1  ;;  %vm400_vm9 = vc.u32 %v4890_v36, %v4893_v39  ;;  %v401_v1 = vadd.s32 1, %v4894_v40 }
  0xf2   :  { %v267_v2 = vor.u32 %v266_v58, %v265_v56  ;;  %vm272_vm10 = vcmp.lt.s32.totalorder %v4854_v45, 2  ;;  %v270_v3 = vor.u32 %v269_v60, %v268_v0  ;;  %vm273_vm11 = vcmp.lt.s32.totalorder %v4854_v45, 3 }
  0xf3   :  { %vm274_vm12 = vcmp.lt.s32.totalorder %v4854_v45, 4  ;;  %v279_v5 = vsel %vm271_vm8, %v258_v42, %v261_v43  ;;  %v402_v44 = vsel %vm400_vm9, %v401_v1, %v4894_v40  ;;  %v283_v8 = vsel %vm271_vm8, %v261_v43, %v264_v63 }
  0xf4   :  { %v276_v7 = vsel %vm274_vm12, %v264_v63, 2102212464  ;;  %v280_v52 = vsel %vm274_vm12, %v267_v2, 920167782  ;;  %v403_v9 = vadd.s32 %v402_v44, %v398_v62  ;;  %v275_v10 = vsel %vm271_vm8, %v255_v41, %v258_v42 }
  0xf5   :  { %v281_v11 = vsel %vm273_vm11, %v264_v63, %v280_v52  ;;  %v284_v12 = vsel %vm274_vm12, %v270_v3, 1326507024  ;;  %v277_v13 = vsel %vm273_vm11, %v261_v43, %v276_v7  ;;  %vm562_vm13 = vcmp.gt.s32.totalorder %v4862_v53, 0  ;;  %v4942_v43 = vpop.f32.mrb[9].mxu0 }
  0xf6   :  { %v282_v14 = vsel %vm272_vm10, %v279_v5, %v281_v11  ;;  %v285_v15 = vsel %vm273_vm11, %v267_v2, %v284_v12  ;;  %v404_v16 = vadd.s32 536870912, %v403_v9  ;;  %v563_v26 = vsel %vm562_vm13, %v4862_v53, 0  ;;  %6668 = vst [vmem:[#allocation7_spill] sm:$0xff] %v4942_v43 }
  0xf7   :  { %v286_v19 = vsel %vm272_vm10, %v283_v8, %v285_v15  ;;  %v4919_v22 = vmul.u32.u64.low %v4856_v46, %v282_v14  ;;  %v4920_v23 = vmul.u32.u64.high %v4856_v46, %v282_v14, %v4919_v22  ;;  %v278_v30 = vsel %vm272_vm10, %v275_v10, %v277_v13 }
  0xf8   :  { %v4924_v24 = vmul.u32.u64.low %v4856_v46, %v286_v19  ;;  %v4925_v25 = vmul.u32.u64.high %v4856_v46, %v286_v19, %v4924_v24  ;;  %v4928_v28 = vshrl.u32 %v404_v16, 30  ;;  %v558_v31 = vand.u32 8388607, %v551_v47 }
  0xf9   :  { %v565_v32 = vand.u32 31, %v563_v26  ;;  %v297_v34 = vadd.s32 1, %v4920_v23  ;;  %v294_v40 = vmul.u32 %v4856_v46, %v278_v30  ;;  %v564_v46 = vshrl.u32 %v563_v26, 5 }
  0xfa   :  { %v406_v33 = vshll.u32 %v4928_v28, 30  ;;  %vm296_vm14 = vc.u32 %v4925_v25, %v4919_v22  ;;  %v559_v45 = vor.u32 8388608, %v558_v31  ;;  %v450_v62 = vand.u32 2139095040, %v4845_v29 }
  0xfb   :  { %v566_v35 = vsub.s32 32, %v565_v32  ;;  %v298_v42 = vsel %vm296_vm14, %v297_v34, %v4920_v23  ;;  %v568_v51 = vshll.u32 %v6610_v50, %v565_v32  ;;  %v571_v60 = vshll.u32 %v6608_v55, %v565_v32 }
  0xfc   :  { %v4939_v53 = vsub.s32 %v403_v9, %v406_v33  ;;  %v299_v49 = vadd.s32 %v298_v42, %v294_v40  ;;  %v574_v1 = vshll.u32 %v6614_v57, %v565_v32  ;;  %v577_v44 = vshll.u32 %v6612_v59, %v565_v32 }
  0xfd   :  { %v569_v41 = vshrl.u32 %v6608_v55, %v566_v35  ;;  %v572_v56 = vshrl.u32 %v6614_v57, %v566_v35  ;;  %v575_v2 = vshrl.u32 %v6612_v59, %v566_v35  ;;  %v578_v7 = vshrl.u32 %v6628_v61, %v566_v35 }
  0xfe   :  { %v409_v58 = vsub.s32 0, %v4939_v53  ;;  %v300_v63 = vadd.s32 536870912, %v299_v49  ;;  %v581_v9 = vshrl.u32 %v6618_v4, %v566_v35  ;;  %v447_v10 = vand.u32 2147483647, %v4845_v29 }
  0xff   :  { %v570_v0 = vor.u32 %v569_v41, %v568_v51  ;;  %v573_v5 = vor.u32 %v572_v56, %v571_v60  ;;  %v576_v8 = vor.u32 %v575_v2, %v574_v1  ;;  %v579_v12 = vor.u32 %v578_v7, %v577_v44 }
 0x100   :  { %v4174_v3 = vmin.u32 %v409_v58, %v4939_v53  ;;  %v4955_v52 = vshrl.u32 %v300_v63, 30  ;;  %v580_v13 = vshll.u32 %v6628_v61, %v565_v32  ;;  %v451_v14 = vshrl.u32 %v450_v62, 23 }
 0x101   :  { %v567_v16 = vshrl.u32 %v6610_v50, %v566_v35  ;;  %vm583_vm15 = vcmp.lt.s32.totalorder %v564_v46, 1  ;;  %v599_v19 = vshll.u32 %v559_v45, 8  ;;  %vm586_vm2 = vcmp.lt.s32.totalorder %v564_v46, 4 }
 0x102   :  { %v411_v11 = vclz %v4174_v3  ;;  %v302_v15 = vshll.u32 %v4955_v52, 30  ;;  %v582_v24 = vor.u32 %v581_v9, %v580_v13  ;;  %v591_v26 = vsel %vm583_vm15, %v570_v0, %v573_v5 }
 0x103   :  { %vm585_vm3 = vcmp.lt.s32.totalorder %v564_v46, 3  ;;  %v588_v31 = vsel %vm586_vm2, %v576_v8, 2102212464  ;;  %v592_v33 = vsel %vm586_vm2, %v579_v12, 920167782  ;;  %vm584_vm5 = vcmp.lt.s32.totalorder %v564_v46, 2 }
 0x104   :  { %v4175_v23 = vadd.s32 4294967294, %v411_v11  ;;  %v4963_v30 = vsub.s32 %v299_v49, %v302_v15  ;;  %v593_v32 = vsel %vm585_vm3, %v576_v8, %v592_v33  ;;  %v4177_v34 = vadd.s32 4294967169, %v451_v14  ;;  %v4994_v46 = vpop.f32.mrb[10].mxu0 }
 0x105   :  { %v587_v42 = vsel %vm583_vm15, %v567_v16, %v570_v0  ;;  %v594_v45 = vsel %vm584_vm5, %v591_v26, %v593_v32  ;;  %v589_v41 = vsel %vm585_vm3, %v573_v5, %v588_v31  ;;  %v595_v56 = vsel %vm583_vm15, %v573_v5, %v576_v8  ;;  %6669 = vst [vmem:[#allocation8_spill] sm:$0xff] %v4994_v46 }
 0x106   :  { %vm4176_vm4 = vcmp.lt.s32.totalorder %v4175_v23, 0  ;;  %v305_v40 = vsub.s32 0, %v4963_v30  ;;  %v596_v60 = vsel %vm586_vm2, %v582_v24, 1326507024  ;;  %v454_v0 = vand.u32 8388607, %v447_v10 }
 0x107   :  { %v414_v35 = vsel %vm4176_vm4, 0, %v4175_v23  ;;  %v4975_v62 = vmul.u32.u64.low %v599_v19, %v594_v45  ;;  %v4976_v63 = vmul.u32.u64.high %v599_v19, %v594_v45, %v4975_v62  ;;  %v597_v2 = vsel %vm585_vm3, %v579_v12, %v596_v60 }
 0x108   :  { %v415_v51 = vsub.s32 32, %v414_v35  ;;  %v419_v49 = vsub.s32 4294967266, %v414_v35  ;;  %v4170_v58 = vmin.u32 %v305_v40, %v4963_v30  ;;  %v399_v3 = vadd.s32 %v4893_v39, %v4890_v36 }
 0x109   :  { %v598_v5 = vsel %vm584_vm5, %v595_v56, %v597_v2  ;;  %v457_v7 = vadd.s32 1, %v4177_v34  ;;  %v590_v9 = vsel %vm584_vm5, %v587_v42, %v589_v41  ;;  %v609_v12 = vadd.s32 1, %v4976_v63 }
 0x10a   :  { %v420_v1 = vadd.s32 127, %v419_v49  ;;  %v307_v44 = vclz %v4170_v58  ;;  %v4986_v11 = vmul.u32.u64.low %v599_v19, %v598_v5  ;;  %v4987_v13 = vmul.u32.u64.high %v599_v19, %v598_v5, %v4986_v11 }
 0x10b   :  { %v417_v14 = vshrl.u32 %v399_v3, %v415_v51  ;;  %vm458_vm6 = vcmp.gt.s32.totalorder %v457_v7, 0  ;;  %v429_v16 = vsub.s32 4, %v4928_v28  ;;  %v416_v36 = vshll.u32 %v4939_v53, %v414_v35 }
 0x10c   :  { %v421_v8 = vshll.u32 %v420_v1, 23  ;;  %v4171_v15 = vadd.s32 4294967294, %v307_v44  ;;  %v459_v23 = vsel %vm458_vm6, %v457_v7, 0  ;;  %v606_v31 = vmul.u32 %v599_v19, %v590_v9 }
 0x10d   :  { %v461_v24 = vand.u32 31, %v459_v23  ;;  %vm608_vm8 = vc.u32 %v4987_v13, %v4975_v62  ;;  %vm345_vm9 = vcmp.lt.s32.totalorder %v4831_v17, 0  ;;  %v418_v33 = vor.u32 %v417_v14, %v416_v36 }
 0x10e   :  { %v422_v39 = vor.u32 4788187, %v421_v8  ;;  %vm4172_vm7 = vcmp.lt.s32.totalorder %v4171_v15, 0  ;;  %v610_v32 = vsel %vm608_vm8, %v609_v12, %v4976_v63  ;;  %v455_v34 = vor.u32 8388608, %v454_v0 }
 0x10f   :  { %v310_v26 = vsel %vm4172_vm7, 0, %v4171_v15  ;;  %v430_v53 = vsel %vm345_vm9, %v429_v16, %v4928_v28  ;;  %v611_v35 = vadd.s32 %v610_v32, %v606_v31  ;;  %v462_v40 = vsub.s32 32, %v461_v24 }
 0x110   :  { %v762_v42 = vand.u32 2139095040, %v4848_v37  ;;  %v423_v19 = vand.u32 2147483647, %v422_v39  ;;  %v315_v45 = vsub.s32 4294967266, %v310_v26  ;;  %vm5004_vm10 = vcmp.le.f32.partialorder %v343_v18, 0.7853982 }
 0x111   :  { %v295_v49 = vadd.s32 %v4919_v22, %v4925_v25  ;;  %v311_v41 = vsub.s32 32, %v310_v26  ;;  %v612_v56 = vadd.s32 536870912, %v611_v35  ;;  %v425_v58 = vcvt.s32.f32 %v418_v33 }
 0x112   :  { %v5012_v28 = vsel %vm5004_vm10, 0, %v430_v53  ;;  %v465_v60 = vshrl.u32 %v6608_v55, %v462_v40  ;;  %v468_v63 = vshrl.u32 %v6614_v57, %v462_v40  ;;  %v471_v18 = vshrl.u32 %v6612_v59, %v462_v40 }
 0x113   :  { %v5016_v1 = vshrl.u32 %v612_v56, 30  ;;  %v5019_v2 = vshll.u32 %v455_v34, 8  ;;  %v763_v0 = vshrl.u32 %v762_v42, 23  ;;  %v426_v3 = vmul.f32 %v425_v58, %v423_v19 }
 0x114   :  { %v316_v22 = vadd.s32 127, %v315_v45  ;;  %v464_v25 = vshll.u32 %v6610_v50, %v461_v24  ;;  %v467_v44 = vshll.u32 %v6608_v55, %v461_v24  ;;  %v313_v5 = vshrl.u32 %v295_v49, %v311_v41 }
 0x115   :  { %v614_v7 = vshll.u32 %v5016_v1, 30  ;;  %v460_v8 = vshrl.u32 %v459_v23, 5  ;;  %v470_v9 = vshll.u32 %v6614_v57, %v461_v24  ;;  %v473_v15 = vshll.u32 %v6612_v59, %v461_v24 }
 0x116   :  { %v466_v11 = vor.u32 %v465_v60, %v464_v25  ;;  %v469_v14 = vor.u32 %v468_v63, %v467_v44  ;;  %v474_v12 = vshrl.u32 %v6628_v61, %v462_v40  ;;  %v476_v39 = vshll.u32 %v6628_v61, %v461_v24 }
 0x117   :  { %v5027_v16 = vsub.s32 %v611_v35, %v614_v7  ;;  %v472_v36 = vor.u32 %v471_v18, %v470_v9  ;;  %v477_v31 = vshrl.u32 %v6618_v4, %v462_v40  ;;  %v427_v33 = vxor.u32 2147483648, %v426_v3 }
 0x118   :  { %v312_v32 = vshll.u32 %v4963_v30, %v310_v26  ;;  %v317_v34 = vshll.u32 %v316_v22, 23  ;;  %v475_v23 = vor.u32 %v474_v12, %v473_v15  ;;  %v463_v42 = vshrl.u32 %v6610_v50, %v462_v40 }
 0x119   :  { %v617_v53 = vsub.s32 0, %v5027_v16  ;;  %v478_v19 = vor.u32 %v477_v31, %v476_v39  ;;  %vm479_vm11 = vcmp.lt.s32.totalorder %v460_v8, 1  ;;  %vm481_vm12 = vcmp.lt.s32.totalorder %v460_v8, 3 }
 0x11a   :  { %v314_v45 = vor.u32 %v313_v5, %v312_v32  ;;  %vm482_vm13 = vcmp.lt.s32.totalorder %v460_v8, 4  ;;  %v487_v35 = vsel %vm479_vm11, %v466_v11, %v469_v14  ;;  %v491_v56 = vsel %vm479_vm11, %v469_v14, %v472_v36 }
 0x11b   :  { %v4182_v49 = vmin.u32 %v617_v53, %v5027_v16  ;;  %v484_v24 = vsel %vm482_vm13, %v472_v36, 2102212464  ;;  %v488_v41 = vsel %vm482_vm13, %v475_v23, 920167782  ;;  %v318_v58 = vor.u32 4788187, %v317_v34 }
 0x11c   :  { %vm480_vm14 = vcmp.lt.s32.totalorder %v460_v8, 2  ;;  %v489_v30 = vsel %vm481_vm12, %v472_v36, %v488_v41  ;;  %v492_v26 = vsel %vm482_vm13, %v478_v19, 1326507024  ;;  %v483_v63 = vsel %vm479_vm11, %v463_v42, %v466_v11 }
 0x11d   :  { %v619_v60 = vclz %v4182_v49  ;;  %v490_v18 = vsel %vm480_vm14, %v487_v35, %v489_v30  ;;  %v493_v40 = vsel %vm481_vm12, %v475_v23, %v492_v26  ;;  %v485_v22 = vsel %vm481_vm12, %v469_v14, %v484_v24 }
 0x11e   :  { %v494_v25 = vsel %vm480_vm14, %v491_v56, %v493_v40  ;;  %v5038_v44 = vmul.u32.u64.low %v5019_v2, %v490_v18  ;;  %v5039_v5 = vmul.u32.u64.high %v5019_v2, %v490_v18, %v5038_v44  ;;  %v319_v12 = vand.u32 2147483647, %v318_v58  ;;  %v5074_v56 = vpop.f32.mrb[11].mxu0 }
 0x11f   :  { %v4183_v7 = vadd.s32 4294967294, %v619_v60  ;;  %v5043_v9 = vmul.u32.u64.low %v5019_v2, %v494_v25  ;;  %v5044_v15 = vmul.u32.u64.high %v5019_v2, %v494_v25, %v5043_v9  ;;  %v4189_v36 = vadd.s32 4294967169, %v763_v0  ;;  %6673 = vst [vmem:[#allocation10_spill] sm:$0xff] %v5074_v56 }
 0x120   :  { %v428_v11 = vsel %vm345_vm9, %v427_v33, %v426_v3  ;;  %v436_v39 = vadd.s32 3, %v5012_v28  ;;  %v486_v14 = vsel %vm480_vm14, %v483_v63, %v485_v22  ;;  %v321_v31 = vcvt.s32.f32 %v314_v45 }
 0x121   :  { %vm4184_vm15 = vcmp.lt.s32.totalorder %v4183_v7, 0  ;;  %v505_v34 = vadd.s32 1, %v5039_v5  ;;  %v769_v23 = vadd.s32 1, %v4189_v36  ;;  %vm241_vm2 = vcmp.lt.s32.totalorder %v4835_v20, 0 }
 0x122   :  { %v5050_v32 = vsel %vm4184_vm15, 0, %v4183_v7  ;;  %v325_v53 = vsub.s32 4, %v4955_v52  ;;  %v6606_v42 = vand.u32 2147483647, %v4848_v37  ;;  %v5057_v3 = vmul.f32 %v321_v31, %v319_v12 }
 0x123   :  { %v627_v0 = vsub.s32 4294967266, %v5050_v32  ;;  %v502_v33 = vmul.u32 %v5019_v2, %v486_v14  ;;  %vm504_vm3 = vc.u32 %v5044_v15, %v5038_v44  ;;  %vm770_vm4 = vcmp.gt.s32.totalorder %v769_v23, 0 }
 0x124   :  { %v5065_v8 = vsel %vm5004_vm10, %v4831_v17, %v428_v11  ;;  %v506_v19 = vsel %vm504_vm3, %v505_v34, %v5039_v5  ;;  %v771_v45 = vsel %vm770_vm4, %v769_v23, 0  ;;  %v658_v35 = vand.u32 2139095040, %v4850_v38 }
 0x125   :  { %v5069_v49 = vand.u32 3, %v436_v39  ;;  %v5072_v24 = vand.u32 3, %v5012_v28  ;;  %v507_v2 = vadd.s32 %v506_v19, %v502_v33  ;;  %v773_v41 = vand.u32 31, %v771_v45 }
 0x126   :  { %v5079_v51 = vsel %vm241_vm2, %v325_v53, %v4955_v52  ;;  %v607_v58 = vadd.s32 %v4975_v62, %v4987_v13  ;;  %v628_v30 = vadd.s32 127, %v627_v0  ;;  %v766_v26 = vand.u32 8388607, %v6606_v42 }
 0x127   :  { %6672 = vst [vmem:[#allocation9_spill] sm:$0xff] %v5072_v24  ;;  %4641 = vcosq.f32 %v5065_v8  ;;  %v323_v28 = vxor.u32 2147483648, %v5057_v3  ;;  %v508_v60 = vadd.s32 536870912, %v507_v2  ;;  %v774_v63 = vsub.s32 32, %v773_v41 }
 0x128   :  { %v623_v18 = vsub.s32 32, %v5050_v32  ;;  %v5088_v40 = vshrl.u32 %v771_v45, 5  ;;  %v776_v52 = vshll.u32 %v6610_v50, %v773_v41  ;;  %v659_v22 = vshrl.u32 %v658_v35, 23 }
 0x129   :  { %v5091_v25 = vshrl.u32 %v508_v60, 30  ;;  %v777_v62 = vshrl.u32 %v6608_v55, %v774_v63  ;;  %v779_v13 = vshll.u32 %v6608_v55, %v773_v41  ;;  %v780_v5 = vshrl.u32 %v6614_v57, %v774_v63 }
 0x12a   :  { %v629_v7 = vshll.u32 %v628_v30, 23  ;;  %v783_v9 = vshrl.u32 %v6612_v59, %v774_v63  ;;  %v785_v12 = vshll.u32 %v6612_v59, %v773_v41  ;;  %v786_v36 = vshrl.u32 %v6628_v61, %v774_v63 }
 0x12b   :  { %v510_v11 = vshll.u32 %v5091_v25, 30  ;;  %v778_v39 = vor.u32 %v777_v62, %v776_v52  ;;  %v781_v14 = vor.u32 %v780_v5, %v779_v13  ;;  %v782_v31 = vshll.u32 %v6614_v57, %v773_v41 }
 0x12c   :  { %v767_v34 = vor.u32 8388608, %v766_v26  ;;  %v787_v23 = vor.u32 %v786_v36, %v785_v12  ;;  %v788_v53 = vshll.u32 %v6628_v61, %v773_v41  ;;  %v789_v0 = vshrl.u32 %v6618_v4, %v774_v63 }
 0x12d   :  { %vm5105_vm5 = vcmp.le.f32.partialorder %v239_v21, 0.7853982  ;;  %v624_v19 = vshll.u32 %v5027_v16, %v5050_v32  ;;  %v5111_v45 = vsub.s32 %v507_v2, %v510_v11  ;;  %v784_v35 = vor.u32 %v783_v9, %v782_v31 }
 0x12e   :  { %v6605_v30 = vand.u32 2147483647, %v4850_v38  ;;  %v625_v26 = vshrl.u32 %v607_v58, %v623_v18  ;;  %v790_v60 = vor.u32 %v789_v0, %v788_v53  ;;  %vm791_vm6 = vcmp.lt.s32.totalorder %v5088_v40, 1 }
 0x12f   :  { %v4185_v41 = vadd.s32 4294967169, %v659_v22  ;;  %v630_v52 = vor.u32 4788187, %v629_v7  ;;  %v513_v62 = vsub.s32 0, %v5111_v45  ;;  %vm794_vm7 = vcmp.lt.s32.totalorder %v5088_v40, 4 }
 0x130   :  { %v799_v21 = vsel %vm791_vm6, %v778_v39, %v781_v14  ;;  %v775_v16 = vshrl.u32 %v6610_v50, %v774_v63  ;;  %vm792_vm8 = vcmp.lt.s32.totalorder %v5088_v40, 2  ;;  %vm793_vm9 = vcmp.lt.s32.totalorder %v5088_v40, 3 }
 0x131   :  { %v800_v32 = vsel %vm794_vm7, %v787_v23, 920167782  ;;  %v5122_v2 = vpop.eup %4641  ;;  %vm553_vm10 = vcmp.lt.s32.totalorder %v4843_v27, 0  ;;  %v4178_v58 = vmin.u32 %v513_v62, %v5111_v45  ;;  %v796_v18 = vsel %vm794_vm7, %v784_v35, 2102212464 }
 0x132   :  { %v801_v22 = vsel %vm793_vm9, %v784_v35, %v800_v32  ;;  %v803_v13 = vsel %vm791_vm6, %v781_v14, %v784_v35  ;;  %v626_v5 = vor.u32 %v625_v26, %v624_v19  ;;  %v804_v7 = vsel %vm794_vm7, %v790_v60, 1326507024  ;;  %v5162_v32 = vpop.f32.mrb[12].mxu0 }
 0x133   :  { %v802_v63 = vsel %vm792_vm8, %v799_v21, %v801_v22  ;;  %v807_v9 = vshll.u32 %v767_v34, 8  ;;  %v631_v12 = vand.u32 2147483647, %v630_v52  ;;  %v515_v36 = vclz %v4178_v58 }
 0x134   :  { %v795_v11 = vsel %vm791_vm6, %v775_v16, %v778_v39  ;;  %v805_v31 = vsel %vm793_vm9, %v787_v23, %v804_v7  ;;  %v797_v53 = vsel %vm793_vm9, %v781_v14, %v796_v18  ;;  %v665_v52 = vadd.s32 1, %v4185_v41 }
 0x135   :  { %v806_v0 = vsel %vm792_vm8, %v803_v13, %v805_v31  ;;  %v5140_v19 = vmul.u32.u64.low %v807_v9, %v802_v63  ;;  %v5141_v35 = vmul.u32.u64.high %v807_v9, %v802_v63, %v5140_v19  ;;  %v4179_v26 = vadd.s32 4294967294, %v515_v36 }
 0x136   :  { %v5144_v34 = vmul.u32.u64.low %v807_v9, %v806_v0  ;;  %v5145_v60 = vmul.u32.u64.high %v807_v9, %v806_v0, %v5144_v34  ;;  %4643 = vsinq.f32 %v5065_v8  ;;  %v5151_v39 = vsel %vm5105_vm5, 0, %v5079_v51 }
 0x137   :  { %v633_v14 = vcvt.s32.f32 %v626_v5  ;;  %v637_v23 = vsub.s32 4, %v5016_v1  ;;  %v324_v62 = vsel %vm241_vm2, %v323_v28, %v5057_v3  ;;  %vm4180_vm11 = vcmp.lt.s32.totalorder %v4179_v26, 0 }
 0x138   :  { %v798_v41 = vsel %vm792_vm8, %v795_v11, %v797_v53  ;;  %vm666_vm12 = vcmp.gt.s32.totalorder %v665_v52, 0  ;;  %v518_v21 = vsel %vm4180_vm11, 0, %v4179_v26  ;;  %v817_v16 = vadd.s32 1, %v5141_v35 }
 0x139   :  { %v634_v8 = vmul.f32 %v633_v14, %v631_v12  ;;  %v667_v51 = vsel %vm666_vm12, %v665_v52, 0  ;;  %v519_v58 = vsub.s32 32, %v518_v21  ;;  %v523_v18 = vsub.s32 4294967266, %v518_v21 }
 0x13a   :  { %v662_v22 = vand.u32 8388607, %v6605_v30  ;;  %v970_v13 = vand.u32 2139095040, %v4859_v48  ;;  %v5170_v3 = vsel %vm553_vm10, %v637_v23, %v5016_v1  ;;  %v814_v28 = vmul.u32 %v807_v9, %v798_v41 }
 0x13b   :  { %vm816_vm13 = vc.u32 %v5145_v60, %v5140_v19  ;;  %v669_v40 = vand.u32 31, %v667_v51  ;;  %v5177_v5 = vsel %vm5105_vm5, %v4835_v20, %v324_v62  ;;  %v503_v63 = vadd.s32 %v5038_v44, %v5044_v15 }
 0x13c   :  { %v818_v7 = vsel %vm816_vm13, %v817_v16, %v5141_v35  ;;  %v6607_v12 = vand.u32 2147483647, %v4859_v48  ;;  %v635_v36 = vxor.u32 2147483648, %v634_v8  ;;  %v524_v1 = vadd.s32 127, %v523_v18 }
 0x13d   :  { %v819_v11 = vadd.s32 %v818_v7, %v814_v28  ;;  %v670_v9 = vsub.s32 32, %v669_v40  ;;  %v521_v31 = vshrl.u32 %v503_v63, %v519_v58  ;;  %v663_v53 = vor.u32 8388608, %v662_v22 }
 0x13e   :  { %v668_v0 = vshrl.u32 %v667_v51, 5  ;;  %v971_v26 = vshrl.u32 %v970_v13, 23  ;;  %v672_v33 = vshll.u32 %v6610_v50, %v669_v40  ;;  %v675_v44 = vshll.u32 %v6608_v55, %v669_v40 }
 0x13f   :  { %v820_v34 = vadd.s32 536870912, %v819_v11  ;;  %v673_v52 = vshrl.u32 %v6608_v55, %v670_v9  ;;  %v676_v14 = vshrl.u32 %v6614_v57, %v670_v9  ;;  %v678_v15 = vshll.u32 %v6614_v57, %v669_v40 }
 0x140   :  { %v679_v35 = vshrl.u32 %v6612_v59, %v670_v9  ;;  %v682_v23 = vshrl.u32 %v6628_v61, %v670_v9  ;;  %v5190_v62 = vpop.eup %4643  ;;  %v525_v41 = vshll.u32 %v524_v1, 23  ;;  %v681_v58 = vshll.u32 %v6612_v59, %v669_v40 }
 0x141   :  { %v5192_v16 = vshrl.u32 %v820_v34, 30  ;;  %v674_v51 = vor.u32 %v673_v52, %v672_v33  ;;  %vm5197_vm14 = vcmp.le.f32.partialorder %v551_v47, 0.7853982  ;;  %v677_v22 = vor.u32 %v676_v14, %v675_v44 }
 0x142   :  { %v680_v13 = vor.u32 %v679_v35, %v678_v15  ;;  %v684_v28 = vshll.u32 %v6628_v61, %v669_v40  ;;  %v685_v63 = vshrl.u32 %v6618_v4, %v670_v9  ;;  %v520_v7 = vshll.u32 %v5111_v45, %v518_v21 }
 0x143   :  { %v533_v1 = vsub.s32 4, %v5091_v25  ;;  %v822_v34 = vshll.u32 %v5192_v16, 30  ;;  %v683_v33 = vor.u32 %v682_v23, %v681_v58  ;;  %v636_v52 = vsel %vm553_vm10, %v635_v36, %v634_v8 }
 0x144   :  { %vm449_vm15 = vcmp.lt.s32.totalorder %v4845_v29, 0  ;;  %v686_v47 = vor.u32 %v685_v63, %v684_v28  ;;  %v703_v30 = vshll.u32 %v663_v53, 8  ;;  %v4197_v14 = vadd.s32 4294967169, %v971_v26 }
 0x145   :  { %v522_v44 = vor.u32 %v521_v31, %v520_v7  ;;  %v5209_v15 = vsub.s32 %v819_v11, %v822_v34  ;;  %vm687_vm2 = vcmp.lt.s32.totalorder %v668_v0, 1  ;;  %vm690_vm3 = vcmp.lt.s32.totalorder %v668_v0, 4 }
 0x146   :  { %v526_v40 = vor.u32 4788187, %v525_v41  ;;  %v671_v45 = vshrl.u32 %v6610_v50, %v670_v9  ;;  %v692_v21 = vsel %vm690_vm3, %v680_v13, 2102212464  ;;  %v695_v35 = vsel %vm687_vm2, %v674_v51, %v677_v22 }
 0x147   :  { %vm5214_vm4 = vcmp.le.f32.partialorder %v447_v10, 0.7853982  ;;  %v825_v8 = vsub.s32 0, %v5209_v15  ;;  %vm689_vm5 = vcmp.lt.s32.totalorder %v668_v0, 3  ;;  %v696_v36 = vsel %vm690_vm3, %v683_v33, 920167782 }
 0x148   :  { %v699_v31 = vsel %vm687_vm2, %v677_v22, %v680_v13  ;;  %vm688_vm6 = vcmp.lt.s32.totalorder %v668_v0, 2  ;;  %v691_v11 = vsel %vm687_vm2, %v671_v45, %v674_v51  ;;  %v697_v53 = vsel %vm689_vm5, %v680_v13, %v696_v36 }
 0x149   :  { %v700_v26 = vsel %vm690_vm3, %v686_v47, 1326507024  ;;  %v4190_v41 = vmin.u32 %v825_v8, %v5209_v15  ;;  %v693_v9 = vsel %vm689_vm5, %v677_v22, %v692_v21  ;;  %v698_v58 = vsel %vm688_vm6, %v695_v35, %v697_v53 }
 0x14a   :  { %v701_v28 = vsel %vm689_vm5, %v683_v33, %v700_v26  ;;  %v527_v63 = vand.u32 2147483647, %v526_v40  ;;  %v5222_v7 = vmul.u32.u64.low %v703_v30, %v698_v58  ;;  %v5223_v34 = vmul.u32.u64.high %v703_v30, %v698_v58, %v5222_v7 }
 0x14b   :  { %v702_v10 = vsel %vm688_vm6, %v699_v31, %v701_v28  ;;  %v5229_v42 = vsel %vm5197_vm14, 0, %v5170_v3  ;;  %v827_v51 = vclz %v4190_v41  ;;  %4645 = vcosq.f32 %v5177_v5 }
 0x14c   :  { %6680 = vst [vmem:[#allocation11_spill] sm:$0xff] %v5229_v42  ;;  %v5231_v13 = vmul.u32.u64.low %v703_v30, %v702_v10  ;;  %v5232_v47 = vmul.u32.u64.high %v703_v30, %v702_v10, %v5231_v13  ;;  %v529_v22 = vcvt.s32.f32 %v522_v44  ;;  %v694_v33 = vsel %vm688_vm6, %v691_v11, %v693_v9  ;;  %v5259_v11 = vpop.f32.mrb[13].mxu0 }
 0x14d   :  { %v977_v40 = vadd.s32 1, %v4197_v14  ;;  %4647 = vsinq.f32 %v5177_v5  ;;  %v5240_v45 = vsel %vm5197_vm14, %v4843_v27, %v636_v52  ;;  %v534_v3 = vsel %vm449_vm15, %v533_v1, %v5091_v25 }
 0x14e   :  { %v4191_v21 = vadd.s32 4294967294, %v827_v51  ;;  %v530_v35 = vmul.f32 %v529_v22, %v527_v63  ;;  %v713_v8 = vadd.s32 1, %v5223_v34  ;;  %v5248_v0 = vand.u32 8388607, %v6607_v12 }
 0x14f   :  { %vm978_vm7 = vcmp.gt.s32.totalorder %v977_v40, 0  ;;  %v710_v5 = vmul.u32 %v703_v30, %v694_v33  ;;  %vm712_vm9 = vc.u32 %v5232_v47, %v5222_v7  ;;  %v5254_v52 = vsel %vm5214_vm4, 0, %v534_v3 }
 0x150   :  { %vm4192_vm8 = vcmp.lt.s32.totalorder %v4191_v21, 0  ;;  %v979_v18 = vsel %vm978_vm7, %v977_v40, 0  ;;  %6681 = vst [vmem:[#allocation12_spill] sm:$0xff] %v5254_v52  ;;  %v714_v1 = vsel %vm712_vm9, %v713_v8, %v5223_v34  ;;  %4649 = vcosq.f32 %v5240_v45 }
 0x151   :  { %v830_v25 = vsel %vm4192_vm8, 0, %v4191_v21  ;;  %v981_v14 = vand.u32 31, %v979_v18  ;;  %v715_v36 = vadd.s32 %v714_v1, %v710_v5  ;;  %v815_v30 = vadd.s32 %v5140_v19, %v5145_v60 }
 0x152   :  { %v835_v44 = vsub.s32 4294967266, %v830_v25  ;;  %v831_v53 = vsub.s32 32, %v830_v25  ;;  %v975_v26 = vor.u32 8388608, %v5248_v0  ;;  %v531_v9 = vxor.u32 2147483648, %v530_v35 }
 0x153   :  { %v982_v41 = vsub.s32 32, %v981_v14  ;;  %v716_v28 = vadd.s32 536870912, %v715_v36  ;;  %v866_v63 = vand.u32 2139095040, %v4864_v54  ;;  %v5265_v10 = vshrl.u32 %v979_v18, 5 }
 0x154   :  { %v836_v58 = vadd.s32 127, %v835_v44  ;;  %v984_v19 = vshll.u32 %v6610_v50, %v981_v14  ;;  %v987_v60 = vshll.u32 %v6608_v55, %v981_v14  ;;  %v832_v3 = vshll.u32 %v5209_v15, %v830_v25 }
 0x155   :  { %v985_v34 = vshrl.u32 %v6608_v55, %v982_v41  ;;  %v988_v51 = vshrl.u32 %v6614_v57, %v982_v41  ;;  %v991_v13 = vshrl.u32 %v6612_v59, %v982_v41  ;;  %v5270_v22 = vshrl.u32 %v716_v28, 30  ;;  %v5275_v40 = vpop.eup %4645 }
 0x156   :  { %v994_v33 = vshrl.u32 %v6628_v61, %v982_v41  ;;  %v833_v21 = vshrl.u32 %v815_v30, %v831_v53  ;;  %v990_v8 = vshll.u32 %v6614_v57, %v981_v14  ;;  %v993_v0 = vshll.u32 %v6612_v59, %v981_v14 }
 0x157   :  { %v5280_v5 = vpop.eup %4647  ;;  %v837_v18 = vshll.u32 %v836_v58, 23  ;;  %v718_v1 = vshll.u32 %v5270_v22, 30  ;;  %v986_v44 = vor.u32 %v985_v34, %v984_v19  ;;  %v989_v28 = vor.u32 %v988_v51, %v987_v60 }
 0x158   :  { %v992_v12 = vor.u32 %v991_v13, %v990_v8  ;;  %v995_v55 = vor.u32 %v994_v33, %v993_v0  ;;  %v996_v31 = vshll.u32 %v6628_v61, %v981_v14  ;;  %v997_v50 = vshrl.u32 %v6618_v4, %v982_v41 }
 0x159   :  { %v532_v15 = vsel %vm449_vm15, %v531_v9, %v530_v35  ;;  %vm761_vm10 = vcmp.lt.s32.totalorder %v4848_v37, 0  ;;  %v845_v25 = vsub.s32 4, %v5192_v16  ;;  %v5289_v30 = vsub.s32 %v715_v36, %v718_v1 }
 0x15a   :  { %v867_v53 = vshrl.u32 %v866_v63, 23  ;;  %v834_v58 = vor.u32 %v833_v21, %v832_v3  ;;  %v6682_v59 = vmov 683565275   ;;  %v998_v51 = vor.u32 %v997_v50, %v996_v31  ;;  %v5293_v13 = vpop.eup %4649 }
 0x15b   :  { %v983_v34 = vshrl.u32 %v6682_v59, %v982_v41  ;;  %vm999_vm11 = vcmp.lt.s32.totalorder %v5265_v10, 1  ;;  %6683 = vst [vmem:[#allocation13_spill] sm:$0xff] %v5293_v13  ;;  %v838_v14 = vor.u32 4788187, %v837_v18  ;;  %v721_v19 = vsub.s32 0, %v5289_v30 }
 0x15c   :  { %vm1002_vm12 = vcmp.lt.s32.totalorder %v5265_v10, 4  ;;  %v1007_v35 = vsel %vm999_vm11, %v986_v44, %v989_v28  ;;  %vm1001_vm13 = vcmp.lt.s32.totalorder %v5265_v10, 3  ;;  %v1011_v9 = vsel %vm999_vm11, %v989_v28, %v992_v12 }
 0x15d   :  { %v1008_v36 = vsel %vm1002_vm12, %v995_v55, 920167782  ;;  %v1012_v41 = vsel %vm1002_vm12, %v998_v51, 1326507024  ;;  %v4186_v50 = vmin.u32 %v721_v19, %v5289_v30  ;;  %vm1000_vm14 = vcmp.lt.s32.totalorder %v5265_v10, 2 }
 0x15e   :  { %v1004_v31 = vsel %vm1002_vm12, %v992_v12, 2102212464  ;;  %v1009_v63 = vsel %vm1001_vm13, %v992_v12, %v1008_v36  ;;  %v1013_v33 = vsel %vm1001_vm13, %v995_v55, %v1012_v41  ;;  %v1015_v3 = vshll.u32 %v975_v26, 8 }
 0x15f   :  { %v1010_v60 = vsel %vm1000_vm14, %v1007_v35, %v1009_v63  ;;  %v4193_v21 = vadd.s32 4294967169, %v867_v53  ;;  %v839_v8 = vand.u32 2147483647, %v838_v14  ;;  %v723_v0 = vclz %v4186_v50 }
 0x160   :  { %v1003_v18 = vsel %vm999_vm11, %v983_v34, %v986_v44  ;;  %v1014_v1 = vsel %vm1000_vm14, %v1011_v9, %v1013_v33  ;;  %v1005_v51 = vsel %vm1001_vm13, %v989_v28, %v1004_v31  ;;  %v841_v36 = vcvt.s32.f32 %v834_v58 }
 0x161   :  { %v5316_v12 = vmul.u32.u64.low %v1015_v3, %v1014_v1  ;;  %v5317_v19 = vmul.u32.u64.high %v1015_v3, %v1014_v1, %v5316_v12  ;;  %v873_v35 = vadd.s32 1, %v4193_v21  ;;  %v4187_v63 = vadd.s32 4294967294, %v723_v0 }
 0x162   :  { %v5319_v55 = vmul.u32.u64.low %v1015_v3, %v1010_v60  ;;  %v5320_v26 = vmul.u32.u64.high %v1015_v3, %v1010_v60, %v5319_v55  ;;  %4651 = vsinq.f32 %v5240_v45  ;;  %v5327_v44 = vsel %vm5214_vm4, %v4845_v29, %v532_v15 }
 0x163   :  { %v5332_v28 = vsel %vm761_vm10, %v845_v25, %v5192_v16  ;;  %vm874_vm15 = vcmp.gt.s32.totalorder %v873_v35, 0  ;;  %v5334_v53 = vmul.f32 %v841_v36, %v839_v8  ;;  %vm4188_vm2 = vcmp.lt.s32.totalorder %v4187_v63, 0  ;;  %v5344_v16 = vpop.f32.mrb[14].mxu0 }
 0x164   :  { %v1006_v58 = vsel %vm1000_vm14, %v1003_v18, %v1005_v51  ;;  %v875_v34 = vsel %vm874_vm15, %v873_v35, 0  ;;  %v711_v45 = vadd.s32 %v5222_v7, %v5232_v47  ;;  %v726_v14 = vsel %vm4188_vm2, 0, %v4187_v63 }
 0x165   :  { %vm1024_vm3 = vc.u32 %v5317_v19, %v5319_v55  ;;  %v6684_v23 = vand.u32 2147483647, %v4864_v54  ;;  %v727_v25 = vsub.s32 32, %v726_v14  ;;  %v731_v9 = vsub.s32 4294967266, %v726_v14 }
 0x166   :  { %v1025_v41 = vadd.s32 1, %v5320_v26  ;;  %v5347_v50 = vshrl.u32 %v875_v34, 5  ;;  %v1022_v31 = vmul.u32 %v1015_v3, %v1006_v58  ;;  %v877_v60 = vand.u32 31, %v875_v34 }
 0x167   :  { %v870_v15 = vand.u32 8388607, %v6684_v23  ;;  %v1178_v7 = vand.u32 2139095040, %v4876_v6  ;;  %v843_v47 = vxor.u32 2147483648, %v5334_v53  ;;  %v729_v33 = vshrl.u32 %v711_v45, %v727_v25 }
 0x168   :  { %v732_v21 = vadd.s32 127, %v731_v9  ;;  %v1026_v8 = vsel %vm1024_vm3, %v1025_v41, %v5320_v26  ;;  %v728_v0 = vshll.u32 %v5289_v30, %v726_v14  ;;  %v878_v51 = vsub.s32 32, %v877_v60 }
 0x169   :  { %v1027_v18 = vadd.s32 %v1026_v8, %v1022_v31  ;;  %v871_v1 = vor.u32 8388608, %v870_v15  ;;  %v880_v35 = vshll.u32 %v6682_v59, %v877_v60  ;;  %v6685_v36 = vmov 2475754826  }
 0x16a   :  { %v733_v12 = vshll.u32 %v732_v21, 23  ;;  %v883_v63 = vshll.u32 %v6685_v36, %v877_v60  ;;  %vm895_vm4 = vcmp.lt.s32.totalorder %v5347_v50, 1  ;;  %v730_v3 = vor.u32 %v729_v33, %v728_v0 }
 0x16b   :  { %v1028_v58 = vadd.s32 536870912, %v1027_v18  ;;  %v881_v34 = vshrl.u32 %v6685_v36, %v878_v51  ;;  %v884_v45 = vshrl.u32 %v6614_v57, %v878_v51  ;;  %v886_v26 = vshll.u32 %v6614_v57, %v877_v60 }
 0x16c   :  { %v6686_v23 = vmov 2102212464   ;;  %v890_v15 = vshrl.u32 %v6628_v61, %v878_v51  ;;  %v5363_v25 = vpop.eup %4651  ;;  %v734_v9 = vor.u32 4788187, %v733_v12  ;;  %v892_v0 = vshll.u32 %v6628_v61, %v877_v60 }
 0x16d   :  { %v887_v30 = vshrl.u32 %v6686_v23, %v878_v51  ;;  %v889_v14 = vshll.u32 %v6686_v23, %v877_v60  ;;  %6687 = vst [vmem:[#allocation14_spill] sm:$0xff] %v5363_v25  ;;  %v5365_v41 = vshrl.u32 %v1028_v58, 30  ;;  %v882_v31 = vor.u32 %v881_v34, %v880_v35 }
 0x16e   :  { %v885_v33 = vor.u32 %v884_v45, %v883_v63  ;;  %v893_v10 = vshrl.u32 %v6618_v4, %v878_v51  ;;  %v6688_v57 = vand.u32 2147483647, %v4848_v37  ;;  %vm657_vm6 = vcmp.lt.s32.totalorder %v4850_v38, 0 }
 0x16f   :  { %v888_v21 = vor.u32 %v887_v30, %v886_v26  ;;  %v891_v8 = vor.u32 %v890_v15, %v889_v14  ;;  %v1030_v12 = vshll.u32 %v5365_v41, 30  ;;  %vm898_vm7 = vcmp.lt.s32.totalorder %v5347_v50, 4 }
 0x170   :  { %vm5371_vm5 = vcmp.le.f32.partialorder %v6688_v57, 0.7853982  ;;  %v903_v35 = vsel %vm895_vm4, %v882_v31, %v885_v33  ;;  %v1179_v63 = vshrl.u32 %v1178_v7, 23  ;;  %v894_v58 = vor.u32 %v893_v10, %v892_v0 }
 0x171   :  { %vm896_vm8 = vcmp.lt.s32.totalorder %v5347_v50, 2  ;;  %vm897_vm9 = vcmp.lt.s32.totalorder %v5347_v50, 3  ;;  %v904_v57 = vsel %vm898_vm7, %v891_v8, 920167782  ;;  %v5384_v60 = vsub.s32 %v1027_v18, %v1030_v12 }
 0x172   :  { %v879_v34 = vshrl.u32 %v6682_v59, %v878_v51  ;;  %v900_v45 = vsel %vm898_vm7, %v888_v21, 2102212464  ;;  %v905_v26 = vsel %vm897_vm9, %v888_v21, %v904_v57  ;;  %v735_v30 = vand.u32 2147483647, %v734_v9 }
 0x173   :  { %v737_v7 = vcvt.s32.f32 %v730_v3  ;;  %v906_v10 = vsel %vm896_vm8, %v903_v35, %v905_v26  ;;  %v911_v14 = vshll.u32 %v871_v1, 8  ;;  %v6691_v15 = vand.u32 2147483647, %v4850_v38 }
 0x174   :  { %v1033_v18 = vsub.s32 0, %v5384_v60  ;;  %v899_v51 = vsel %vm895_vm4, %v879_v34, %v882_v31  ;;  %v907_v12 = vsel %vm895_vm4, %v885_v33, %v888_v21  ;;  %v908_v3 = vsel %vm898_vm7, %v894_v58, 1326507024 }
 0x175   :  { %vm5395_vm11 = vcmp.le.f32.partialorder %v6691_v15, 0.7853982  ;;  %v901_v1 = vsel %vm897_vm9, %v885_v33, %v900_v45  ;;  %v909_v9 = vsel %vm897_vm9, %v891_v8, %v908_v3  ;;  %v6617_v21 = vand.u32 2147483647, %v4876_v6  ;;  %v5448_v3 = vpop.f32.mrb[15].mxu0 }
 0x176   :  { %v5410_v35 = vmul.u32.u64.low %v911_v14, %v906_v10  ;;  %v5411_v57 = vmul.u32.u64.high %v911_v14, %v906_v10, %v5410_v35  ;;  %v4198_v26 = vmin.u32 %v1033_v18, %v5384_v60  ;;  %v910_v31 = vsel %vm896_vm8, %v907_v12, %v909_v9 }
 0x177   :  { %v4205_v34 = vadd.s32 4294967169, %v1179_v63  ;;  %v844_v58 = vsel %vm761_vm10, %v843_v47, %v5334_v53  ;;  %v738_v33 = vmul.f32 %v737_v7, %v735_v30  ;;  %4653 = vcosq.f32 %v5327_v44 }
 0x178   :  { %v5421_v45 = vmul.u32.u64.low %v911_v14, %v910_v31  ;;  %v5422_v15 = vmul.u32.u64.high %v911_v14, %v910_v31, %v5421_v45  ;;  %v1035_v8 = vclz %v4198_v26  ;;  %v902_v10 = vsel %vm896_vm8, %v899_v51, %v901_v1 }
 0x179   :  { %v1185_v18 = vadd.s32 1, %v4205_v34  ;;  %4655 = vsinq.f32 %v5327_v44  ;;  %v5431_v63 = vsel %vm5371_vm5, 0, %v5332_v28  ;;  %v6695_v53 = vsub.s32 4, %v5270_v22 }
 0x17a   :  { %6694 = vst [vmem:[#allocation15_spill] sm:$0xff] %v5431_v63  ;;  %v921_v30 = vadd.s32 1, %v5411_v57  ;;  %v5442_v50 = vsel %vm5371_vm5, %v4848_v37, %v844_v58  ;;  %v4199_v7 = vadd.s32 4294967294, %v1035_v8  ;;  %v1182_v44 = vand.u32 8388607, %v6617_v21 }
 0x17b   :  { %v742_v47 = vsel %vm657_vm6, %v6695_v53, %v5270_v22  ;;  %vm1186_vm10 = vcmp.gt.s32.totalorder %v1185_v18, 0  ;;  %v739_v28 = vxor.u32 2147483648, %v738_v33  ;;  %v918_v51 = vmul.u32 %v911_v14, %v902_v10 }
 0x17c   :  { %vm920_vm12 = vc.u32 %v5422_v15, %v5410_v35  ;;  %v1187_v12 = vsel %vm1186_vm10, %v1185_v18, 0  ;;  %vm4200_vm13 = vcmp.lt.s32.totalorder %v4199_v7, 0  ;;  %v1074_v13 = vand.u32 2139095040, %v4942_v43 }
 0x17d   :  { %v922_v22 = vsel %vm920_vm12, %v921_v30, %v5411_v57  ;;  %v1189_v1 = vand.u32 31, %v1187_v12  ;;  %4657 = vcosq.f32 %v5442_v50  ;;  %v5455_v9 = vsel %vm5395_vm11, 0, %v742_v47 }
 0x17e   :  { %6696 = vst [vmem:[#allocation16_spill] sm:$0xff] %v5455_v9  ;;  %v1038_v26 = vsel %vm4200_vm13, 0, %v4199_v7  ;;  %v923_v14 = vadd.s32 %v922_v22, %v918_v51  ;;  %v1023_v31 = vadd.s32 %v5319_v55, %v5317_v19  ;;  %v5462_v57 = vsel %vm657_vm6, %v739_v28, %v738_v33 }
 0x17f   :  { %v1043_v34 = vsub.s32 4294967266, %v1038_v26  ;;  %v1190_v45 = vsub.s32 32, %v1189_v1  ;;  %v1183_v10 = vor.u32 8388608, %v1182_v44  ;;  %v1039_v53 = vsub.s32 32, %v1038_v26 }
 0x180   :  { %v924_v8 = vadd.s32 536870912, %v923_v14  ;;  %v1075_v7 = vshrl.u32 %v1074_v13, 23  ;;  %v1192_v19 = vshll.u32 %v6682_v59, %v1189_v1  ;;  %v6697_v55 = vmov 2131351028  }
 0x181   :  { %v1044_v47 = vadd.s32 127, %v1043_v34  ;;  %v1193_v30 = vshrl.u32 %v6685_v36, %v1190_v45  ;;  %v1196_v22 = vshrl.u32 %v6697_v55, %v1190_v45  ;;  %v1199_v21 = vshrl.u32 %v6686_v23, %v1190_v45  ;;  %v5471_v58 = vpop.eup %4653 }
 0x182   :  { %v5466_v51 = vshrl.u32 %v924_v8, 30  ;;  %6698 = vst [vmem:[#allocation17_spill] sm:$0xff] %v5471_v58  ;;  %v1195_v44 = vshll.u32 %v6685_v36, %v1189_v1  ;;  %v1201_v28 = vshll.u32 %v6686_v23, %v1189_v1  ;;  %v1202_v34 = vshrl.u32 %v6628_v61, %v1190_v45 }
 0x183   :  { %v1045_v33 = vshll.u32 %v1044_v47, 23  ;;  %v5476_v4 = vpop.eup %4655  ;;  %v1188_v8 = vshrl.u32 %v1187_v12, 5  ;;  %v1198_v18 = vshll.u32 %v6697_v55, %v1189_v1  ;;  %v5480_v63 = vshll.u32 %v1183_v10, 8 }
 0x184   :  { %6699 = vst [vmem:[#allocation18_spill] sm:$0xff] %v5476_v4  ;;  %v926_v13 = vshll.u32 %v5466_v51, 30  ;;  %v1194_v37 = vor.u32 %v1193_v30, %v1192_v19  ;;  %v1197_v9 = vor.u32 %v1196_v22, %v1195_v44  ;;  %v1203_v25 = vor.u32 %v1202_v34, %v1201_v28 }
 0x185   :  { %v6700_v47 = vand.u32 2147483647, %v4942_v43  ;;  %vm969_vm14 = vcmp.lt.s32.totalorder %v4859_v48, 0  ;;  %v1200_v61 = vor.u32 %v1199_v21, %v1198_v18  ;;  %v6701_v29 = vmov 920167782  }
 0x186   :  { %v5487_v42 = vsub.s32 %v923_v14, %v926_v13  ;;  %v1204_v58 = vshll.u32 %v6701_v29, %v1189_v1  ;;  %v6702_v4 = vmov 1326507024   ;;  %v1040_v52 = vshll.u32 %v5384_v60, %v1038_v26 }
 0x187   :  { %v5484_v27 = vand.u32 8388607, %v6700_v47  ;;  %v1205_v12 = vshrl.u32 %v6702_v4, %v1190_v45  ;;  %v1041_v10 = vshrl.u32 %v1023_v31, %v1039_v53  ;;  %v1046_v24 = vor.u32 4788187, %v1045_v33  ;;  %v5492_v19 = vpop.eup %4657 }
 0x188   :  { %v4201_v30 = vadd.s32 4294967169, %v1075_v7  ;;  %v929_v22 = vsub.s32 0, %v5487_v42  ;;  %vm1207_vm15 = vcmp.lt.s32.totalorder %v1188_v8, 1  ;;  %vm1210_vm2 = vcmp.lt.s32.totalorder %v1188_v8, 4 }
 0x189   :  { %v1206_v44 = vor.u32 %v1205_v12, %v1204_v58  ;;  %vm1208_vm3 = vcmp.lt.s32.totalorder %v1188_v8, 2  ;;  %vm1209_vm4 = vcmp.lt.s32.totalorder %v1188_v8, 3  ;;  %v1215_v21 = vsel %vm1207_vm15, %v1194_v37, %v1197_v9 }
 0x18a   :  { %v1216_v14 = vsel %vm1210_vm2, %v1203_v25, 920167782  ;;  %v4194_v1 = vmin.u32 %v929_v22, %v5487_v42  ;;  %v1212_v18 = vsel %vm1210_vm2, %v1200_v61, 2102212464  ;;  %v1219_v60 = vsel %vm1207_vm15, %v1197_v9, %v1200_v61 }
 0x18b   :  { %v1217_v28 = vsel %vm1209_vm4, %v1200_v61, %v1216_v14  ;;  %v1042_v26 = vor.u32 %v1041_v10, %v1040_v52  ;;  %v1191_v31 = vshrl.u32 %v6682_v59, %v1190_v45  ;;  %v1220_v7 = vsel %vm1210_vm2, %v1206_v44, 1326507024 }
 0x18c   :  { %v1218_v53 = vsel %vm1208_vm3, %v1215_v21, %v1217_v28  ;;  %v931_v58 = vclz %v4194_v1  ;;  %v1221_v33 = vsel %vm1209_vm4, %v1203_v25, %v1220_v7  ;;  %v1213_v12 = vsel %vm1209_vm4, %v1197_v9, %v1212_v18 }
 0x18d   :  { %v5501_v34 = vmul.u32.u64.low %v5480_v63, %v1218_v53  ;;  %v5502_v13 = vmul.u32.u64.high %v5480_v63, %v1218_v53, %v5501_v34  ;;  %v1211_v47 = vsel %vm1207_vm15, %v1191_v31, %v1194_v37  ;;  %v1222_v22 = vsel %vm1208_vm3, %v1219_v60, %v1221_v33 }
 0x18e   :  { %v1081_v14 = vadd.s32 1, %v4201_v30  ;;  %v1047_v61 = vand.u32 2147483647, %v1046_v24  ;;  %v4195_v52 = vadd.s32 4294967294, %v931_v58  ;;  %4659 = vsinq.f32 %v5442_v50 }
 0x18f   :  { %v5508_v45 = vmul.u32.u64.low %v5480_v63, %v1222_v22  ;;  %v5509_v10 = vmul.u32.u64.high %v5480_v63, %v1222_v22, %v5508_v45  ;;  %v1049_v25 = vcvt.s32.f32 %v1042_v26  ;;  %v6703_v44 = vsub.s32 4, %v5365_v41 }
 0x190   :  { %vm1082_vm5 = vcmp.gt.s32.totalorder %v1081_v14, 0  ;;  %vm4196_vm6 = vcmp.lt.s32.totalorder %v4195_v52, 0  ;;  %v1214_v37 = vsel %vm1208_vm3, %v1211_v47, %v1213_v12  ;;  %v1233_v24 = vadd.s32 1, %v5502_v13 }
 0x191   :  { %v5517_v21 = vsel %vm969_vm14, %v6703_v44, %v5365_v41  ;;  %v1083_v9 = vsel %vm1082_vm5, %v1081_v14, 0  ;;  %v5525_v50 = vsel %vm5395_vm11, %v4850_v38, %v5462_v57  ;;  %v919_v30 = vadd.s32 %v5410_v35, %v5422_v15 }
 0x192   :  { %v934_v1 = vsel %vm4196_vm6, 0, %v4195_v52  ;;  %v1085_v18 = vand.u32 31, %v1083_v9  ;;  %v1050_v41 = vmul.f32 %v1049_v25, %v1047_v61  ;;  %v1079_v8 = vor.u32 8388608, %v5484_v27 }
 0x193   :  { %v935_v28 = vsub.s32 32, %v934_v1  ;;  %v939_v60 = vsub.s32 4294967266, %v934_v1  ;;  %v936_v26 = vshll.u32 %v5487_v42, %v934_v1  ;;  %v1230_v31 = vmul.u32 %v5480_v63, %v1214_v37 }
 0x194   :  { %vm1232_vm7 = vc.u32 %v5509_v10, %v5501_v34  ;;  %v1086_v0 = vsub.s32 32, %v1085_v18  ;;  %v1088_v35 = vshll.u32 %v6682_v59, %v1085_v18  ;;  %v1091_v33 = vshll.u32 %v6685_v36, %v1085_v18 }
 0x195   :  { %v937_v57 = vshrl.u32 %v919_v30, %v935_v28  ;;  %v940_v53 = vadd.s32 127, %v939_v60  ;;  %v1234_v7 = vsel %vm1232_vm7, %v1233_v24, %v5502_v13  ;;  %v1094_v63 = vshll.u32 %v6697_v55, %v1085_v18 }
 0x196   :  { %v1235_v15 = vadd.s32 %v1234_v7, %v1230_v31  ;;  %v1089_v58 = vshrl.u32 %v6685_v36, %v1086_v0  ;;  %v1092_v27 = vshrl.u32 %v6697_v55, %v1086_v0  ;;  %v1095_v12 = vshrl.u32 %v6686_v23, %v1086_v0 }
 0x197   :  { %v938_v42 = vor.u32 %v937_v57, %v936_v26  ;;  %v941_v47 = vshll.u32 %v940_v53, 23  ;;  %v1084_v14 = vshrl.u32 %v1083_v9, 5  ;;  %v1097_v61 = vshll.u32 %v6686_v23, %v1085_v18 }
 0x198   :  { %v1236_v22 = vadd.s32 536870912, %v1235_v15  ;;  %v1098_v13 = vshrl.u32 %v6701_v29, %v1086_v0  ;;  %v1090_v45 = vor.u32 %v1089_v58, %v1088_v35  ;;  %v1093_v25 = vor.u32 %v1092_v27, %v1091_v33  ;;  %v5543_v37 = vpop.eup %4659 }
 0x199   :  { %v942_v52 = vor.u32 4788187, %v941_v47  ;;  %v1096_v44 = vor.u32 %v1095_v12, %v1094_v63  ;;  %v1100_v1 = vshll.u32 %v6701_v29, %v1085_v18  ;;  %v1101_v28 = vshrl.u32 %v6702_v4, %v1086_v0 }
 0x19a   :  { %v5545_v24 = vshrl.u32 %v1236_v22, 30  ;;  %v1099_v30 = vor.u32 %v1098_v13, %v1097_v61  ;;  %v6704_v60 = vand.u32 2147483647, %v4859_v48  ;;  %v1051_v26 = vxor.u32 2147483648, %v1050_v41  ;;  %v4706_v13 = vld [vmem:[%s6599_s0 + $0x10] sm:$0xff] }
 0x19b   :  { %vm865_vm9 = vcmp.lt.s32.totalorder %v4864_v54, 0  ;;  %v943_v31 = vand.u32 2147483647, %v942_v52  ;;  %v945_v57 = vcvt.s32.f32 %v938_v42  ;;  %v1087_v53 = vshrl.u32 %v6682_v59, %v1086_v0 }
 0x19c   :  { %vm5551_vm8 = vcmp.le.f32.partialorder %v6704_v60, 0.7853982  ;;  %v1238_v7 = vshll.u32 %v5545_v24, 30  ;;  %v1102_v35 = vor.u32 %v1101_v28, %v1100_v1  ;;  %vm1103_vm11 = vcmp.lt.s32.totalorder %v1084_v14, 1 }
 0x19d   :  { %vm1106_vm10 = vcmp.lt.s32.totalorder %v1084_v14, 4  ;;  %vm1105_vm12 = vcmp.lt.s32.totalorder %v1084_v14, 3  ;;  %v1111_v58 = vsel %vm1103_vm11, %v1090_v45, %v1093_v25  ;;  %v946_v27 = vmul.f32 %v945_v57, %v943_v31 }
 0x19e   :  { %v1108_v18 = vsel %vm1106_vm10, %v1096_v44, 2102212464  ;;  %v1112_v33 = vsel %vm1106_vm10, %v1099_v30, 920167782  ;;  %v5561_v47 = vsub.s32 %v1235_v15, %v1238_v7  ;;  %vm1104_vm13 = vcmp.lt.s32.totalorder %v1084_v14, 2 }
 0x19f   :  { %v1113_v42 = vsel %vm1105_vm12, %v1096_v44, %v1112_v33  ;;  %v949_v0 = vsub.s32 4, %v5466_v51  ;;  %v1107_v63 = vsel %vm1103_vm11, %v1087_v53, %v1090_v45  ;;  %v1119_v22 = vshll.u32 %v1079_v8, 8 }
 0x1a0   :  { %v1114_v12 = vsel %vm1104_vm13, %v1111_v58, %v1113_v42  ;;  %v6707_v61 = vand.u32 2147483647, %v4864_v54  ;;  %v1241_v52 = vsub.s32 0, %v5561_v47  ;;  %v1109_v15 = vsel %vm1105_vm12, %v1093_v25, %v1108_v18 }
 0x1a1   :  { %v1115_v1 = vsel %vm1103_vm11, %v1093_v25, %v1096_v44  ;;  %v1116_v28 = vsel %vm1106_vm10, %v1102_v35, 1326507024  ;;  %v1052_v45 = vsel %vm969_vm14, %v1051_v26, %v1050_v41  ;;  %vm1177_vm2 = vcmp.lt.s32.totalorder %v4876_v6, 0 }
 0x1a2   :  { %vm5569_vm15 = vcmp.le.f32.partialorder %v6707_v61, 0.7853982  ;;  %v1117_v8 = vsel %vm1105_vm12, %v1099_v30, %v1116_v28  ;;  %v5581_v60 = vmul.u32.u64.low %v1119_v22, %v1114_v12  ;;  %v5582_v31 = vmul.u32.u64.high %v1119_v22, %v1114_v12, %v5581_v60  ;;  %v238_v28 = vld [vmem:[%s6600_s2] sm:$0x7] }
 0x1a3   :  { %v947_v57 = vxor.u32 2147483648, %v946_v27  ;;  %v4206_v53 = vmin.u32 %v1241_v52, %v5561_v47  ;;  %v1118_v7 = vsel %vm1104_vm13, %v1115_v1, %v1117_v8  ;;  %v6637_v25 = vand.u32 2147483647, %v4994_v46  ;;  %4475 = vmatprep.subr.msk.mxu1 %vm89_vm0, %v238_v28 }
 0x1a4   :  { %v1110_v44 = vsel %vm1104_vm13, %v1107_v63, %v1109_v15  ;;  %v5589_v35 = vmul.u32.u64.low %v1119_v22, %v1118_v7  ;;  %v5590_v18 = vmul.u32.u64.high %v1119_v22, %v1118_v7, %v5589_v35  ;;  %v1386_v41 = vand.u32 2139095040, %v4994_v46  ;;  %4476 = vmatpush3.msk.msra.mxu1 %vm89_vm0, %v238_v28 }
 0x1a5   :  { %4661 = vcosq.f32 %v5525_v50  ;;  %v5597_v30 = vsel %vm5551_vm8, 0, %v5517_v21  ;;  %v950_v26 = vsel %vm865_vm9, %v949_v0, %v5466_v51  ;;  %v1243_v58 = vclz %v4206_v53 }
 0x1a6   :  { %6710 = vst [vmem:[#allocation19_spill] sm:$0xff] %v5597_v30  ;;  %v1055_v14 = vsel %vm5551_vm8, %v4859_v48, %v1052_v45  ;;  %v6711_v33 = vand.u32 2147483647, %v4876_v6  ;;  %v1129_v63 = vadd.s32 1, %v5582_v31  ;;  %v1387_v12 = vshrl.u32 %v1386_v41, 23 }
 0x1a7   :  { %v1282_v21 = vand.u32 2139095040, %v5074_v56  ;;  %v4207_v61 = vadd.s32 4294967294, %v1243_v58  ;;  %v1261_v52 = vsub.s32 4, %v5545_v24  ;;  %v1126_v51 = vmul.u32 %v1119_v22, %v1110_v44  ;;  %v4705_v44 = vld [vmem:[%s6599_s0 + $0x8] sm:$0xff] }
 0x1a8   :  { %vm5607_vm14 = vcmp.le.f32.partialorder %v6711_v33, 0.7853982  ;;  %v1390_v0 = vand.u32 8388607, %v6637_v25  ;;  %v948_v9 = vsel %vm865_vm9, %v947_v57, %v946_v27  ;;  %vm1128_vm3 = vc.u32 %v5590_v18, %v5581_v60  ;;  %4478 = vmatmul.mubr.msk.f32.vlgmr.msra.gmra.mrb[0].mxu1 %vm40_vm1, %v4705_v44 }
 0x1a9   :  { %v4213_v15 = vadd.s32 4294967169, %v1387_v12  ;;  %v6636_v1 = vand.u32 2147483647, %v5074_v56  ;;  %4663 = vsinq.f32 %v5525_v50  ;;  %vm4208_vm4 = vcmp.lt.s32.totalorder %v4207_v61, 0  ;;  %4480 = vmatprep.mubr.msk.f32.mxu1 %vm40_vm1, %v4706_v13 }
 0x1aa   :  { %v1130_v22 = vsel %vm1128_vm3, %v1129_v63, %v5582_v31  ;;  %v1283_v45 = vshrl.u32 %v1282_v21, 23  ;;  %v5629_v27 = vsel %vm5569_vm15, 0, %v950_v26  ;;  %v1246_v8 = vsel %vm4208_vm4, 0, %v4207_v61 }
 0x1ab   :  { %v1131_v57 = vadd.s32 %v1130_v22, %v1126_v51  ;;  %v1393_v53 = vadd.s32 1, %v4213_v15  ;;  %4665 = vcosq.f32 %v1055_v14  ;;  %v5635_v50 = vsel %vm5569_vm15, %v4864_v54, %v948_v9  ;;  %v4708_v22 = vld [vmem:[%s6599_s0 + $0x20] sm:$0xff] }
 0x1ac   :  { %v1251_v7 = vsub.s32 4294967266, %v1246_v8  ;;  %v1262_v31 = vsel %vm1177_vm2, %v1261_v52, %v5545_v24  ;;  %v1391_v41 = vor.u32 8388608, %v1390_v0  ;;  %v1286_v26 = vand.u32 8388607, %v6636_v1 }
 0x1ad   :  { %v1132_v35 = vadd.s32 536870912, %v1131_v57  ;;  %vm1394_vm0 = vcmp.gt.s32.totalorder %v1393_v53, 0  ;;  %v1247_v58 = vsub.s32 32, %v1246_v8  ;;  %v4209_v63 = vadd.s32 4294967169, %v1283_v45 }
 0x1ae   :  { %v1252_v24 = vadd.s32 127, %v1251_v7  ;;  %v1395_v33 = vsel %vm1394_vm0, %v1393_v53, 0  ;;  %4667 = vsinq.f32 %v1055_v14  ;;  %v1231_v12 = vadd.s32 %v5501_v34, %v5509_v10  ;;  %v4707_v34 = vld [vmem:[%s6599_s0 + $0x18] sm:$0xff] }
 0x1af   :  { %v5652_v21 = vshrl.u32 %v1132_v35, 30  ;;  %v1397_v61 = vand.u32 31, %v1395_v33  ;;  %v5654_v52 = vpop.eup %4661  ;;  %4669 = vcosq.f32 %v5635_v50  ;;  %v5659_v0 = vsel %vm5607_vm14, 0, %v1262_v31  ;;  %4481 = vmatmul.mubr.msk.f32.gmra.mrb[2].mxu1 %vm40_vm1, %v4707_v34 }
 0x1b0   :  { %v1253_v51 = vshll.u32 %v1252_v24, 23  ;;  %6714 = vst [vmem:[#allocation20_spill] sm:$0xff] %v5659_v0  ;;  %v5663_v9 = vadd.s32 %v5581_v60, %v5590_v18  ;;  %v5670_v15 = vshll.u32 %v1391_v41, 8  ;;  %v1287_v28 = vor.u32 8388608, %v1286_v26  ;;  %4483 = vmatprep.mubr.msk.f32.mxu1 %vm40_vm1, %v4708_v22 }
 0x1b1   :  { %v1134_v10 = vshll.u32 %v5652_v21, 30  ;;  %v1398_v14 = vsub.s32 32, %v1397_v61  ;;  %v1248_v60 = vshll.u32 %v5561_v47, %v1246_v8  ;;  %v1249_v18 = vshrl.u32 %v1231_v12, %v1247_v58  ;;  %v4709_v8 = vld [vmem:[%s6599_s0 + $0x28] sm:$0xff]  ;;  %v4710_v12 = vld [vmem:[%s6599_s0 + $0x30] sm:$0xff] }
 0x1b2   :  { %v5677_v45 = vshrl.u32 %v1395_v33, 5  ;;  %v1289_v53 = vadd.s32 1, %v4209_v63  ;;  %v1254_v7 = vor.u32 4788187, %v1253_v51  ;;  %v1400_v44 = vshll.u32 %v6682_v59, %v1397_v61 }
 0x1b3   :  { %v5679_v31 = vsub.s32 %v1131_v57, %v1134_v10  ;;  %v1401_v35 = vshrl.u32 %v6685_v36, %v1398_v14  ;;  %v5683_v41 = vpop.eup %4663  ;;  %v1403_v26 = vshll.u32 %v6685_v36, %v1397_v61  ;;  %v1404_v13 = vshrl.u32 %v6697_v55, %v1398_v14  ;;  %4484 = vmatmul.mubr.msk.f32.gmra.mrb[4].mxu1 %vm40_vm1, %v4709_v8 }
 0x1b4   :  { %v1406_v24 = vshll.u32 %v6697_v55, %v1397_v61  ;;  %v1407_v47 = vshrl.u32 %v6686_v23, %v1398_v14  ;;  %v1409_v58 = vshll.u32 %v6686_v23, %v1397_v61  ;;  %v1410_v33 = vshrl.u32 %v6701_v29, %v1398_v14  ;;  %4486 = vmatprep.mubr.msk.f32.mxu1 %vm40_vm1, %v4710_v12 }
 0x1b5   :  { %v1137_v57 = vsub.s32 0, %v5679_v31  ;;  %v5696_v63 = vshll.u32 %v1287_v28, 8  ;;  %v5702_v51 = vpop.eup %4665  ;;  %v1250_v34 = vor.u32 %v1249_v18, %v1248_v60  ;;  %v1402_v10 = vor.u32 %v1401_v35, %v1400_v44  ;;  %v4711_v60 = vld [vmem:[%s6599_s0 + $0x38] sm:$0xff] }
 0x1b6   :  { %6715 = vst [vmem:[#allocation21_spill] sm:$0xff] %v5702_v51  ;;  %v1405_v22 = vor.u32 %v1404_v13, %v1403_v26  ;;  %v1408_v8 = vor.u32 %v1407_v47, %v1406_v24  ;;  %v1411_v25 = vor.u32 %v1410_v33, %v1409_v58  ;;  %v1412_v0 = vshll.u32 %v6701_v29, %v1397_v61 }
 0x1b7   :  { %v4202_v1 = vmin.u32 %v1137_v57, %v5679_v31  ;;  %v1413_v28 = vshrl.u32 %v6702_v4, %v1398_v14  ;;  %v1255_v48 = vand.u32 2147483647, %v1254_v7  ;;  %v1399_v30 = vshrl.u32 %v6682_v59, %v1398_v14  ;;  %4487 = vmatmul.mubr.msk.f32.gmra.mrb[6].mxu1 %vm40_vm1, %v4711_v60  ;;  %v4712_v14 = vld [vmem:[%s6599_s0 + $0x40] sm:$0xff] }
 0x1b8   :  { %vm1418_vm5 = vcmp.lt.s32.totalorder %v5677_v45, 4  ;;  %vm1290_vm6 = vcmp.gt.s32.totalorder %v1289_v53, 0  ;;  %v5713_v18 = vpop.eup %4667  ;;  %vm1415_vm7 = vcmp.lt.s32.totalorder %v5677_v45, 1  ;;  %4489 = vmatprep.mubr.msk.f32.mxu1 %vm40_vm1, %v4712_v14  ;;  %v1257_v26 = vcvt.s32.f32 %v1250_v34  ;;  %v4713_v34 = vld [vmem:[%s6599_s0 + $0x48] sm:$0xff] }
 0x1b9   :  { %v1139_v44 = vclz %v4202_v1  ;;  %v1414_v35 = vor.u32 %v1413_v28, %v1412_v0  ;;  %v1420_v61 = vsel %vm1418_vm5, %v1408_v8, 2102212464  ;;  %v5722_v7 = vpop.eup %4669  ;;  %vm1417_vm8 = vcmp.lt.s32.totalorder %v5677_v45, 3 }
 0x1ba   :  { %v1423_v13 = vsel %vm1415_vm7, %v1402_v10, %v1405_v22  ;;  %v1424_v1 = vsel %vm1418_vm5, %v1411_v25, 920167782  ;;  %vm1416_vm9 = vcmp.lt.s32.totalorder %v5677_v45, 2  ;;  %v1419_v24 = vsel %vm1415_vm7, %v1399_v30, %v1402_v10  ;;  %v4714_v10 = vld [vmem:[%s6599_s0 + $0x50] sm:$0xff] }
 0x1bb   :  { %v4203_v0 = vadd.s32 4294967294, %v1139_v44  ;;  %v1425_v47 = vsel %vm1417_vm8, %v1408_v8, %v1424_v1  ;;  %v1421_v57 = vsel %vm1417_vm8, %v1405_v22, %v1420_v61  ;;  %v1427_v33 = vsel %vm1415_vm7, %v1405_v22, %v1408_v8  ;;  %4490 = vmatmul.mubr.msk.f32.gmra.mrb[8].mxu1 %vm40_vm1, %v4713_v34 }
 0x1bc   :  { %v1426_v58 = vsel %vm1416_vm9, %v1423_v13, %v1425_v47  ;;  %v1428_v12 = vsel %vm1418_vm5, %v1414_v35, 1326507024  ;;  %v1258_v28 = vmul.f32 %v1257_v26, %v1255_v48  ;;  %v1291_v30 = vsel %vm1290_vm6, %v1289_v53, 0  ;;  %4492 = vmatprep.mubr.msk.f32.mxu1 %vm40_vm1, %v4714_v10 }
 0x1bd   :  { %vm4204_vm11 = vcmp.lt.s32.totalorder %v4203_v0, 0  ;;  %v1429_v60 = vsel %vm1417_vm8, %v1411_v25, %v1428_v12  ;;  %v5744_v44 = vmul.u32.u64.low %v5670_v15, %v1426_v58  ;;  %v5745_v35 = vmul.u32.u64.high %v5670_v15, %v1426_v58, %v5744_v44 }
 0x1be   :  { %v1142_v22 = vsel %vm4204_vm11, 0, %v4203_v0  ;;  %v1430_v8 = vsel %vm1416_vm9, %v1427_v33, %v1429_v60  ;;  %v1422_v25 = vsel %vm1416_vm9, %v1419_v24, %v1421_v57  ;;  %v1293_v1 = vand.u32 31, %v1291_v30  ;;  %v4715_v0 = vld [vmem:[%s6599_s0 + $0x58] sm:$0xff]  ;;  %v4716_v57 = vld [vmem:[%s6599_s0 + $0x60] sm:$0xff] }
 0x1bf   :  { %v1143_v48 = vsub.s32 32, %v1142_v22  ;;  %v1147_v61 = vsub.s32 4294967266, %v1142_v22  ;;  %v5753_v26 = vmul.u32.u64.low %v5670_v15, %v1430_v8  ;;  %v5754_v13 = vmul.u32.u64.high %v5670_v15, %v1430_v8, %v5753_v26  ;;  %4493 = vmatmul.mubr.msk.f32.gmra.mrb[10].mxu1 %vm40_vm1, %v4715_v0 }
 0x1c0   :  { %v1259_v47 = vxor.u32 2147483648, %v1258_v28  ;;  %v1144_v58 = vshll.u32 %v5679_v31, %v1142_v22  ;;  %4495 = vmatprep.mubr.msk.f32.mxu1 %vm40_vm1, %v4716_v57  ;;  %v1438_v33 = vmul.u32 %v5670_v15, %v1422_v25  ;;  %v1441_v12 = vadd.s32 1, %v5745_v35 }
 0x1c1   :  { %v1145_v45 = vshrl.u32 %v5663_v9, %v1143_v48  ;;  %v1148_v24 = vadd.s32 127, %v1147_v61  ;;  %v5768_v34 = vshrl.u32 %v1291_v30, 5  ;;  %v1294_v60 = vsub.s32 32, %v1293_v1  ;;  %v4717_v30 = vld [vmem:[%s6599_s0 + $0x68] sm:$0xff] }
 0x1c2   :  { %v1296_v31 = vshll.u32 %v6682_v59, %v1293_v1  ;;  %v1299_v9 = vshll.u32 %v6685_v36, %v1293_v1  ;;  %vm1440_vm10 = vc.u32 %v5754_v13, %v5744_v44  ;;  %v1302_v48 = vshll.u32 %v6697_v55, %v1293_v1 }
 0x1c3   :  { %v1146_v10 = vor.u32 %v1145_v45, %v1144_v58  ;;  %v1149_v8 = vshll.u32 %v1148_v24, 23  ;;  %v1297_v22 = vshrl.u32 %v6685_v36, %v1294_v60  ;;  %v1305_v15 = vshll.u32 %v6686_v23, %v1293_v1  ;;  %4496 = vmatmul.mubr.msk.f32.gmra.mrb[12].mxu1 %vm40_vm1, %v4717_v30  ;;  %v4718_v58 = vld [vmem:[%s6599_s0 + $0x70] sm:$0xff] }
 0x1c4   :  { %v1442_v26 = vsel %vm1440_vm10, %v1441_v12, %v5745_v35  ;;  %v1300_v0 = vshrl.u32 %v6697_v55, %v1294_v60  ;;  %4498 = vmatprep.mubr.msk.f32.mxu1 %vm40_vm1, %v4718_v58  ;;  %vm1073_vm12 = vcmp.lt.s32.totalorder %v4942_v43, 0  ;;  %v1303_v57 = vshrl.u32 %v6686_v23, %v1294_v60 }
 0x1c5   :  { %v1150_v61 = vor.u32 4788187, %v1149_v8  ;;  %v1153_v25 = vcvt.s32.f32 %v1146_v10  ;;  %v1443_v45 = vadd.s32 %v1442_v26, %v1438_v33  ;;  %v1298_v24 = vor.u32 %v1297_v22, %v1296_v31  ;;  %v4719_v33 = vld [vmem:[%s6599_s0 + $0x78] sm:$0xff] }
 0x1c6   :  { %v1306_v30 = vshrl.u32 %v6701_v29, %v1294_v60  ;;  %v1301_v10 = vor.u32 %v1300_v0, %v1299_v9  ;;  %v1308_v35 = vshll.u32 %v6701_v29, %v1293_v1  ;;  %v1309_v12 = vshrl.u32 %v6702_v4, %v1294_v60 }
 0x1c7   :  { %v1151_v8 = vand.u32 2147483647, %v1150_v61  ;;  %v1260_v53 = vsel %vm1177_vm2, %v1259_v47, %v1258_v28  ;;  %v1444_v14 = vadd.s32 536870912, %v1443_v45  ;;  %v1304_v51 = vor.u32 %v1303_v57, %v1302_v48  ;;  %4499 = vmatmul.mubr.msk.f32.gmra.mrb[14].mxu1 %vm40_vm1, %v4719_v33 }
 0x1c8   :  { %v1307_v58 = vor.u32 %v1306_v30, %v1305_v15  ;;  %v6716_v31 = vand.u32 2147483647, %v4942_v43  ;;  %v1310_v22 = vor.u32 %v1309_v12, %v1308_v35  ;;  %vm1311_vm15 = vcmp.lt.s32.totalorder %v5768_v34, 1 }
 0x1c9   :  { %v1154_v1 = vmul.f32 %v1153_v25, %v1151_v8  ;;  %vm1314_vm2 = vcmp.lt.s32.totalorder %v5768_v34, 4  ;;  %v1445_v28 = vshrl.u32 %v1444_v14, 30  ;;  %vm1313_vm3 = vcmp.lt.s32.totalorder %v5768_v34, 3 }
 0x1ca   :  { %vm5800_vm13 = vcmp.le.f32.partialorder %v6716_v31, 0.7853982  ;;  %v1319_v47 = vsel %vm1311_vm15, %v1298_v24, %v1301_v10  ;;  %v1320_v48 = vsel %vm1314_vm2, %v1307_v58, 920167782  ;;  %vm1385_vm1 = vcmp.lt.s32.totalorder %v4994_v46, 0 }
 0x1cb   :  { %v1295_v15 = vshrl.u32 %v6682_v59, %v1294_v60  ;;  %vm1312_vm4 = vcmp.lt.s32.totalorder %v5768_v34, 2  ;;  %v1316_v61 = vsel %vm1314_vm2, %v1304_v51, 2102212464  ;;  %v1321_v25 = vsel %vm1313_vm3, %v1304_v51, %v1320_v48 }
 0x1cc   :  { %v1155_v26 = vxor.u32 2147483648, %v1154_v1  ;;  %v1446_v0 = vshll.u32 %v1445_v28, 30  ;;  %v1322_v14 = vsel %vm1312_vm4, %v1319_v47, %v1321_v25  ;;  %v1323_v57 = vsel %vm1311_vm15, %v1301_v10, %v1304_v51 }
 0x1cd   :  { %v1324_v30 = vsel %vm1314_vm2, %v1310_v22, 1326507024  ;;  %v5819_v8 = vmul.u32.u64.low %v5696_v63, %v1322_v14  ;;  %v5820_v35 = vmul.u32.u64.high %v5696_v63, %v1322_v14, %v5819_v8  ;;  %v1594_v60 = vand.u32 2139095040, %v5162_v32 }
 0x1ce   :  { %v6719_v12 = vand.u32 2147483647, %v4994_v46  ;;  %v5829_v31 = vsub.s32 %v1443_v45, %v1446_v0  ;;  %v1315_v47 = vsel %vm1311_vm15, %v1295_v15, %v1298_v24  ;;  %v1317_v51 = vsel %vm1313_vm3, %v1301_v10, %v1316_v61 }
 0x1cf   :  { %v1325_v22 = vsel %vm1313_vm3, %v1307_v58, %v1324_v30  ;;  %v1263_v48 = vsel %vm5607_vm14, %v4876_v6, %v1260_v53  ;;  %v6722_v25 = vsub.s32 4, %v5652_v21  ;;  %v1469_v0 = vsub.s32 4, %v1445_v28 }
 0x1d0   :  { %vm5825_vm0 = vcmp.le.f32.partialorder %v6719_v12, 0.7853982  ;;  %v1326_v24 = vsel %vm1312_vm4, %v1323_v57, %v1325_v22  ;;  %v1156_v10 = vsel %vm1073_vm12, %v1155_v26, %v1154_v1  ;;  %v1449_v15 = vsub.s32 0, %v5829_v31 }
 0x1d1   :  { %v1158_v45 = vsel %vm1073_vm12, %v6722_v25, %v5652_v21  ;;  %v5851_v58 = vmul.u32.u64.low %v5696_v63, %v1326_v24  ;;  %v5852_v61 = vmul.u32.u64.high %v5696_v63, %v1326_v24, %v5851_v58  ;;  %4671 = vsinq.f32 %v5635_v50 }
 0x1d2   :  { %v1318_v42 = vsel %vm1312_vm4, %v1315_v47, %v1317_v51  ;;  %v1337_v21 = vadd.s32 1, %v5820_v35  ;;  %v1595_v53 = vshrl.u32 %v1594_v60, 23  ;;  %4673 = vcosq.f32 %v1263_v48 }
 0x1d3   :  { %v5860_v14 = vsel %vm5800_vm13, 0, %v1158_v45  ;;  %v4214_v1 = vmin.u32 %v1449_v15, %v5829_v31  ;;  %v6724_v26 = vand.u32 2147483647, %v5162_v32  ;;  %v1159_v50 = vsel %vm5800_vm13, %v4942_v43, %v1156_v10 }
 0x1d4   :  { %6723 = vst [vmem:[#allocation22_spill] sm:$0xff] %v5860_v14  ;;  %v4221_v30 = vadd.s32 4294967169, %v1595_v53  ;;  %v6643_v34 = vand.u32 2147483647, %v5259_v11  ;;  %v1490_v12 = vand.u32 2139095040, %v5259_v11  ;;  %v1470_v47 = vsel %vm1385_vm1, %v1469_v0, %v1445_v28 }
 0x1d5   :  { %v1598_v57 = vand.u32 8388607, %v6724_v26  ;;  %v1451_v60 = vclz %v4214_v1  ;;  %v1334_v51 = vmul.u32 %v5696_v63, %v1318_v42  ;;  %vm1336_vm14 = vc.u32 %v5852_v61, %v5819_v8 }
 0x1d6   :  { %4675 = vsinq.f32 %v1263_v48  ;;  %v1439_v22 = vadd.s32 %v5744_v44, %v5754_v13  ;;  %v1338_v9 = vsel %vm1336_vm14, %v1337_v21, %v5820_v35  ;;  %v1601_v25 = vadd.s32 1, %v4221_v30 }
 0x1d7   :  { %4677 = vcosq.f32 %v1159_v50  ;;  %v4215_v45 = vadd.s32 4294967294, %v1451_v60  ;;  %v1339_v24 = vadd.s32 %v1338_v9, %v1334_v51  ;;  %v1599_v10 = vor.u32 8388608, %v1598_v57 }
 0x1d8   :  { %v5879_v15 = vsel %vm5825_vm0, 0, %v1470_v47  ;;  %vm1602_vm5 = vcmp.gt.s32.totalorder %v1601_v25, 0  ;;  %v1491_v28 = vshrl.u32 %v1490_v12, 23  ;;  %v5883_v63 = vand.u32 8388607, %v6643_v34 }
 0x1d9   :  { %6725 = vst [vmem:[#allocation23_spill] sm:$0xff] %v5879_v15  ;;  %4679 = vsinq.f32 %v1159_v50  ;;  %vm4216_vm6 = vcmp.lt.s32.totalorder %v4215_v45, 0  ;;  %v1340_v44 = vadd.s32 536870912, %v1339_v24  ;;  %v1603_v13 = vsel %vm1602_vm5, %v1601_v25, 0 }
 0x1da   :  { %v1454_v35 = vsel %vm4216_vm6, 0, %v4215_v45  ;;  %v5886_v48 = vadd.s32 %v5819_v8, %v5852_v61  ;;  %v1605_v0 = vand.u32 31, %v1603_v13  ;;  %v5891_v1 = vshll.u32 %v1599_v10, 8 }
 0x1db   :  { %v1455_v42 = vsub.s32 32, %v1454_v35  ;;  %v1459_v21 = vsub.s32 4294967266, %v1454_v35  ;;  %v5889_v53 = vshrl.u32 %v1340_v44, 30  ;;  %v5893_v26 = vpop.eup %4671  ;;  %v1456_v57 = vshll.u32 %v5829_v31, %v1454_v35 }
 0x1dc   :  { %v1606_v50 = vsub.s32 32, %v1605_v0  ;;  %v4217_v30 = vadd.s32 4294967169, %v1491_v28  ;;  %v5897_v60 = vpop.eup %4673  ;;  %v1608_v51 = vshll.u32 %v6682_v59, %v1605_v0  ;;  %v1611_v25 = vshll.u32 %v6685_v36, %v1605_v0 }
 0x1dd   :  { %6726 = vst [vmem:[#allocation24_spill] sm:$0xff] %v5897_v60  ;;  %v1457_v8 = vshrl.u32 %v1439_v22, %v1455_v42  ;;  %v1460_v61 = vadd.s32 127, %v1459_v21  ;;  %v1342_v47 = vshll.u32 %v5889_v53, 30  ;;  %v1614_v35 = vshll.u32 %v6697_v55, %v1605_v0 }
 0x1de   :  { %v1609_v9 = vshrl.u32 %v6685_v36, %v1606_v50  ;;  %v1612_v45 = vshrl.u32 %v6697_v55, %v1606_v50  ;;  %v1615_v31 = vshrl.u32 %v6686_v23, %v1606_v50  ;;  %v1604_v42 = vshrl.u32 %v1603_v13, 5 }
 0x1df   :  { %v1458_v10 = vor.u32 %v1457_v8, %v1456_v57  ;;  %v1461_v28 = vshll.u32 %v1460_v61, 23  ;;  %v5905_v44 = vsub.s32 %v1339_v24, %v1342_v47  ;;  %v1497_v34 = vadd.s32 1, %v4217_v30 }
 0x1e0   :  { %v5908_v22 = vpop.eup %4675  ;;  %v1610_v21 = vor.u32 %v1609_v9, %v1608_v51  ;;  %v1802_v58 = vand.u32 2139095040, %v5344_v16  ;;  %v1613_v60 = vor.u32 %v1612_v45, %v1611_v25  ;;  %v1616_v43 = vor.u32 %v1615_v31, %v1614_v35 }
 0x1e1   :  { %6727 = vst [vmem:[#allocation25_spill] sm:$0xff] %v5908_v22  ;;  %v5911_v12 = vpop.eup %4677  ;;  %v1462_v15 = vor.u32 4788187, %v1461_v28  ;;  %v1345_v6 = vsub.s32 0, %v5905_v44  ;;  %v1617_v57 = vshll.u32 %v6686_v23, %v1605_v0  ;;  %v1618_v24 = vshrl.u32 %v6701_v29, %v1606_v50 }
 0x1e2   :  { %6728 = vst [vmem:[#allocation26_spill] sm:$0xff] %v5911_v12  ;;  %v1620_v8 = vshll.u32 %v6701_v29, %v1605_v0  ;;  %v1621_v61 = vshrl.u32 %v6702_v4, %v1606_v50  ;;  %v1465_v47 = vcvt.s32.f32 %v1458_v10  ;;  %v1607_v9 = vshrl.u32 %v6682_v59, %v1606_v50 }
 0x1e3   :  { %v5918_v13 = vpop.eup %4679  ;;  %v1463_v30 = vand.u32 2147483647, %v1462_v15  ;;  %v4210_v51 = vmin.u32 %v1345_v6, %v5905_v44  ;;  %v1619_v28 = vor.u32 %v1618_v24, %v1617_v57  ;;  %vm1623_vm7 = vcmp.lt.s32.totalorder %v1604_v42, 1 }
 0x1e4   :  { %6729 = vst [vmem:[#allocation27_spill] sm:$0xff] %v5918_v13  ;;  %v1622_v22 = vor.u32 %v1621_v61, %v1620_v8  ;;  %vm1626_vm8 = vcmp.lt.s32.totalorder %v1604_v42, 4  ;;  %vm1281_vm9 = vcmp.lt.s32.totalorder %v5074_v56, 0  ;;  %vm1625_vm11 = vcmp.lt.s32.totalorder %v1604_v42, 3 }
 0x1e5   :  { %v1466_v25 = vmul.f32 %v1465_v47, %v1463_v30  ;;  %v1347_v45 = vclz %v4210_v51  ;;  %v1628_v0 = vsel %vm1626_vm8, %v1616_v43, 2102212464  ;;  %v1631_v31 = vsel %vm1623_vm7, %v1610_v21, %v1613_v60 }
 0x1e6   :  { %v1632_v35 = vsel %vm1626_vm8, %v1619_v28, 920167782  ;;  %v1635_v12 = vsel %vm1623_vm7, %v1613_v60, %v1616_v43  ;;  %v1636_v13 = vsel %vm1626_vm8, %v1622_v22, 1326507024  ;;  %vm1624_vm10 = vcmp.lt.s32.totalorder %v1604_v42, 2 }
 0x1e7   :  { %v1467_v15 = vxor.u32 2147483648, %v1466_v25  ;;  %v4211_v10 = vadd.s32 4294967294, %v1347_v45  ;;  %v1633_v6 = vsel %vm1625_vm11, %v1616_v43, %v1632_v35  ;;  %v1627_v14 = vsel %vm1623_vm7, %v1607_v9, %v1610_v21 }
 0x1e8   :  { %v1629_v50 = vsel %vm1625_vm11, %v1613_v60, %v1628_v0  ;;  %v1637_v57 = vsel %vm1625_vm11, %v1619_v28, %v1636_v13  ;;  %vm1498_vm12 = vcmp.gt.s32.totalorder %v1497_v34, 0  ;;  %v1365_v24 = vsub.s32 4, %v5889_v53 }
 0x1e9   :  { %vm4212_vm13 = vcmp.lt.s32.totalorder %v4211_v10, 0  ;;  %v1634_v8 = vsel %vm1624_vm10, %v1631_v31, %v1633_v6  ;;  %v1638_v61 = vsel %vm1624_vm10, %v1635_v12, %v1637_v57  ;;  %v1499_v22 = vsel %vm1498_vm12, %v1497_v34, 0 }
 0x1ea   :  { %v1350_v30 = vsel %vm4212_vm13, 0, %v4211_v10  ;;  %v5927_v47 = vmul.u32.u64.low %v5891_v1, %v1638_v61  ;;  %v5928_v51 = vmul.u32.u64.high %v5891_v1, %v1638_v61, %v5927_v47  ;;  %v1468_v43 = vsel %vm1385_vm1, %v1467_v15, %v1466_v25 }
 0x1eb   :  { %v1351_v21 = vsub.s32 32, %v1350_v30  ;;  %v1355_v60 = vsub.s32 4294967266, %v1350_v30  ;;  %v1630_v13 = vsel %vm1624_vm10, %v1627_v14, %v1629_v50  ;;  %v6730_v12 = vor.u32 8388608, %v5883_v63 }
 0x1ec   :  { %v5934_v9 = vmul.u32.u64.low %v5891_v1, %v1634_v8  ;;  %v5935_v28 = vmul.u32.u64.high %v5891_v1, %v1634_v8, %v5934_v9  ;;  %v1803_v0 = vshrl.u32 %v1802_v58, 23  ;;  %v1352_v31 = vshll.u32 %v5905_v44, %v1350_v30 }
 0x1ed   :  { %v5940_v45 = vshll.u32 %v6730_v12, 8  ;;  %v1353_v34 = vshrl.u32 %v5886_v48, %v1351_v21  ;;  %v1356_v35 = vadd.s32 127, %v1355_v60  ;;  %v1501_v25 = vand.u32 31, %v1499_v22 }
 0x1ee   :  { %v1471_v14 = vsel %vm5825_vm0, %v4994_v46, %v1468_v43  ;;  %v1366_v42 = vsel %vm1281_vm9, %v1365_v24, %v5889_v53  ;;  %v1646_v15 = vmul.u32 %v5891_v1, %v1630_v13  ;;  %v5951_v63 = vshrl.u32 %v1499_v22, 5 }
 0x1ef   :  { %v1354_v10 = vor.u32 %v1353_v34, %v1352_v31  ;;  %v1357_v58 = vshll.u32 %v1356_v35, 23  ;;  %vm1648_vm15 = vc.u32 %v5928_v51, %v5934_v9  ;;  %v1502_v48 = vsub.s32 32, %v1501_v25 }
 0x1f0   :  { %v1649_v44 = vadd.s32 1, %v5935_v28  ;;  %v1504_v6 = vshll.u32 %v6682_v59, %v1501_v25  ;;  %v1507_v33 = vshll.u32 %v6685_v36, %v1501_v25  ;;  %v1510_v50 = vshll.u32 %v6697_v55, %v1501_v25 }
 0x1f1   :  { %v1358_v57 = vor.u32 4788187, %v1357_v58  ;;  %v1361_v53 = vcvt.s32.f32 %v1354_v10  ;;  %v1505_v1 = vshrl.u32 %v6685_v36, %v1502_v48  ;;  %v1513_v24 = vshll.u32 %v6686_v23, %v1501_v25 }
 0x1f2   :  { %v1650_v8 = vsel %vm1648_vm15, %v1649_v44, %v5935_v28  ;;  %v1508_v61 = vshrl.u32 %v6697_v55, %v1502_v48  ;;  %v1511_v30 = vshrl.u32 %v6686_v23, %v1502_v48  ;;  %v1514_v47 = vshrl.u32 %v6701_v29, %v1502_v48 }
 0x1f3   :  { %v6731_v22 = vand.u32 2147483647, %v5074_v56  ;;  %v1359_v21 = vand.u32 2147483647, %v1358_v57  ;;  %v1651_v60 = vadd.s32 %v1650_v8, %v1646_v15  ;;  %v1506_v13 = vor.u32 %v1505_v1, %v1504_v6 }
 0x1f4   :  { %v1516_v12 = vshll.u32 %v6701_v29, %v1501_v25  ;;  %v1509_v31 = vor.u32 %v1508_v61, %v1507_v33  ;;  %v1512_v34 = vor.u32 %v1511_v30, %v1510_v50  ;;  %v1515_v28 = vor.u32 %v1514_v47, %v1513_v24 }
 0x1f5   :  { %vm5967_vm2 = vcmp.le.f32.partialorder %v6731_v22, 0.7853982  ;;  %v1517_v35 = vshrl.u32 %v6702_v4, %v1502_v48  ;;  %v1362_v10 = vmul.f32 %v1361_v53, %v1359_v21  ;;  %v1652_v58 = vadd.s32 536870912, %v1651_v60 }
 0x1f6   :  { %v1503_v44 = vshrl.u32 %v6682_v59, %v1502_v48  ;;  %vm1519_vm3 = vcmp.lt.s32.totalorder %v5951_v63, 1  ;;  %vm1521_vm1 = vcmp.lt.s32.totalorder %v5951_v63, 3  ;;  %vm1522_vm4 = vcmp.lt.s32.totalorder %v5951_v63, 4 }
 0x1f7   :  { %v1518_v22 = vor.u32 %v1517_v35, %v1516_v12  ;;  %v1527_v15 = vsel %vm1519_vm3, %v1506_v13, %v1509_v31  ;;  %v1363_v6 = vxor.u32 2147483648, %v1362_v10  ;;  %v1653_v57 = vshrl.u32 %v1652_v58, 30  ;;  %v1903_v58 = vld [vmem:[%s6601_s3] sm:$0xff] }
 0x1f8   :  { %v1524_v25 = vsel %vm1522_vm4, %v1512_v34, 2102212464  ;;  %v1528_v33 = vsel %vm1522_vm4, %v1515_v28, 920167782  ;;  %vm1520_vm0 = vcmp.lt.s32.totalorder %v5951_v63, 2  ;;  %v1531_v53 = vsel %vm1519_vm3, %v1509_v31, %v1512_v34 }
 0x1f9   :  { %v1529_v50 = vsel %vm1521_vm1, %v1512_v34, %v1528_v33  ;;  %v1532_v1 = vsel %vm1522_vm4, %v1518_v22, 1326507024  ;;  %vm1593_vm14 = vcmp.lt.s32.totalorder %v5162_v32, 0  ;;  %v1654_v48 = vshll.u32 %v1653_v57, 30 }
 0x1fa   :  { %v1523_v24 = vsel %vm1519_vm3, %v1503_v44, %v1506_v13  ;;  %v1530_v8 = vsel %vm1520_vm0, %v1527_v15, %v1529_v50  ;;  %v4229_v61 = vadd.s32 4294967169, %v1803_v0  ;;  %v1525_v30 = vsel %vm1521_vm1, %v1509_v31, %v1524_v25 }
 0x1fb   :  { %v1533_v47 = vsel %vm1521_vm1, %v1515_v28, %v1532_v1  ;;  %v5988_v21 = vmul.u32.u64.low %v5940_v45, %v1530_v8  ;;  %v5989_v12 = vmul.u32.u64.high %v5940_v45, %v1530_v8, %v5988_v21  ;;  %4681 = vcosq.f32 %v1471_v14 }
 0x1fc   :  { %v1364_v34 = vsel %vm1281_vm9, %v1363_v6, %v1362_v10  ;;  %v5994_v13 = vsub.s32 %v1651_v60, %v1654_v48  ;;  %v1534_v0 = vsel %vm1520_vm0, %v1531_v53, %v1533_v47  ;;  %4683 = vsinq.f32 %v1471_v14  ;;  %v1904_v60 = vld [vmem:[%s6601_s3 + $0x8] sm:$0xff] }
 0x1fd   :  { %v6000_v31 = vsel %vm5967_vm2, 0, %v1366_v42  ;;  %v6003_v28 = vmul.u32.u64.low %v5940_v45, %v1534_v0  ;;  %v6004_v35 = vmul.u32.u64.high %v5940_v45, %v1534_v0, %v6003_v28  ;;  %v1526_v14 = vsel %vm1520_vm0, %v1523_v24, %v1525_v30 }
 0x1fe   :  { %6734 = vst [vmem:[#allocation28_spill] sm:$0xff] %v6000_v31  ;;  %v1657_v10 = vsub.s32 0, %v5994_v13  ;;  %v6735_v42 = vand.u32 2147483647, %v5344_v16  ;;  %v1809_v22 = vadd.s32 1, %v4229_v61  ;;  %v1367_v15 = vsel %vm5967_vm2, %v5074_v56, %v1364_v34 }
 0x1ff   :  { %v1647_v6 = vadd.s32 %v5934_v9, %v5928_v51  ;;  %v1677_v25 = vsub.s32 4, %v1653_v57  ;;  %v1545_v33 = vadd.s32 1, %v5989_v12  ;;  %v4531_v63 = vpack.c.bf16 %v1904_v60, %v1903_v58  ;;  %v1905_v51 = vld [vmem:[%s6601_s3 + $0x10] sm:$0xff] }
 0x200   :  { %v1806_v44 = vand.u32 8388607, %v6735_v42  ;;  %v4222_v50 = vmin.u32 %v1657_v10, %v5994_v13  ;;  %vm1810_vm5 = vcmp.gt.s32.totalorder %v1809_v22, 0  ;;  %v1542_v1 = vmul.u32 %v5940_v45, %v1526_v14 }
 0x201   :  { %vm1544_vm6 = vc.u32 %v6004_v35, %v5988_v21  ;;  %v1811_v48 = vsel %vm1810_vm5, %v1809_v22, 0  ;;  %v1698_v43 = vand.u32 2139095040, %v5448_v3  ;;  %4685 = vcosq.f32 %v1367_v15  ;;  %4532 = vmatprep.subr.bf16.mxu0 %v4531_v63 }
 0x202   :  { %v1807_v53 = vor.u32 8388608, %v1806_v44  ;;  %v1659_v9 = vclz %v4222_v50  ;;  %v1546_v24 = vsel %vm1544_vm6, %v1545_v33, %v5989_v12  ;;  %v1813_v8 = vand.u32 31, %v1811_v48  ;;  %4534 = vmatpush3.bf16.msra.mxu0 %v4531_v63 }
 0x203   :  { %4687 = vsinq.f32 %v1367_v15  ;;  %v6034_v45 = vsel %vm1593_vm14, %v1677_v25, %v1653_v57  ;;  %v1547_v61 = vadd.s32 %v1546_v24, %v1542_v1  ;;  %v6037_v34 = vshrl.u32 %v1811_v48, 5  ;;  %4449 = vmatprep.subr.mxu0 %v1905_v51 }
 0x204   :  { %v4223_v47 = vadd.s32 4294967294, %v1659_v9  ;;  %v1814_v0 = vsub.s32 32, %v1813_v8  ;;  %v6039_v28 = vshll.u32 %v1807_v53, 8  ;;  %v1816_v12 = vshll.u32 %v6682_v59, %v1813_v8 }
 0x205   :  { %v1548_v58 = vadd.s32 536870912, %v1547_v61  ;;  %v1819_v60 = vshll.u32 %v6685_v36, %v1813_v8  ;;  %v6043_v10 = vshrl.u32 %v1698_v43, 23  ;;  %v6045_v57 = vpop.eup %4681  ;;  %v1822_v44 = vshll.u32 %v6697_v55, %v1813_v8 }
 0x206   :  { %6736 = vst [vmem:[#allocation29_spill] sm:$0xff] %v6045_v57  ;;  %vm4224_vm7 = vcmp.lt.s32.totalorder %v4223_v47, 0  ;;  %v1817_v14 = vshrl.u32 %v6685_v36, %v1814_v0  ;;  %v1820_v42 = vshrl.u32 %v6697_v55, %v1814_v0  ;;  %v6050_v22 = vpop.eup %4683  ;;  %v1823_v33 = vshrl.u32 %v6686_v23, %v1814_v0  ;;  %4450 = vmatpush3.msra.mxu0 %v1905_v51 }
 0x207   :  { %6737 = vst [vmem:[#allocation30_spill] sm:$0xff] %v6050_v22  ;;  %v1662_v15 = vsel %vm4224_vm7, 0, %v4223_v47  ;;  %v1549_v25 = vshrl.u32 %v1548_v58, 30  ;;  %v1826_v50 = vshrl.u32 %v6701_v29, %v1814_v0  ;;  %v1825_v1 = vshll.u32 %v6686_v23, %v1813_v8 }
 0x208   :  { %v1663_v53 = vsub.s32 32, %v1662_v15  ;;  %v1667_v63 = vsub.s32 4294967266, %v1662_v15  ;;  %v1828_v48 = vshll.u32 %v6701_v29, %v1813_v8  ;;  %v1664_v43 = vshll.u32 %v5994_v13, %v1662_v15 }
 0x209   :  { %v1550_v9 = vshll.u32 %v1549_v25, 30  ;;  %v1818_v24 = vor.u32 %v1817_v14, %v1816_v12  ;;  %v1821_v30 = vor.u32 %v1820_v42, %v1819_v60  ;;  %v1824_v47 = vor.u32 %v1823_v33, %v1822_v44 }
 0x20a   :  { %v1665_v46 = vshrl.u32 %v1647_v6, %v1663_v53  ;;  %v1668_v57 = vadd.s32 127, %v1667_v63  ;;  %v1829_v58 = vshrl.u32 %v6702_v4, %v1814_v0  ;;  %vm1489_vm8 = vcmp.lt.s32.totalorder %v5259_v11, 0 }
 0x20b   :  { %v6059_v22 = vsub.s32 %v1547_v61, %v1550_v9  ;;  %v1815_v51 = vshrl.u32 %v6682_v59, %v1814_v0  ;;  %v1827_v56 = vor.u32 %v1826_v50, %v1825_v1  ;;  %v6738_v31 = vand.u32 2147483647, %v5448_v3  ;;  %v6066_v13 = vpop.eup %4685 }
 0x20c   :  { %6739 = vst [vmem:[#allocation31_spill] sm:$0xff] %v6066_v13  ;;  %v6740_v12 = vand.u32 2147483647, %v5162_v32  ;;  %v1666_v60 = vor.u32 %v1665_v46, %v1664_v43  ;;  %v1669_v14 = vshll.u32 %v1668_v57, 23  ;;  %v1573_v42 = vsub.s32 4, %v1549_v25 }
 0x20d   :  { %v6064_v8 = vand.u32 8388607, %v6738_v31  ;;  %v1830_v61 = vor.u32 %v1829_v58, %v1828_v48  ;;  %v6074_v44 = vpop.eup %4687  ;;  %v1553_v0 = vsub.s32 0, %v6059_v22  ;;  %vm1831_vm11 = vcmp.lt.s32.totalorder %v6037_v34, 1 }
 0x20e   :  { %vm6070_vm9 = vcmp.le.f32.partialorder %v6740_v12, 0.7853982  ;;  %6743 = vst [vmem:[#allocation32_spill] sm:$0xff] %v6074_v44  ;;  %vm1832_vm10 = vcmp.lt.s32.totalorder %v6037_v34, 2  ;;  %vm1834_vm12 = vcmp.lt.s32.totalorder %v6037_v34, 4  ;;  %vm1833_vm15 = vcmp.lt.s32.totalorder %v6037_v34, 3 }
 0x20f   :  { %v1670_v31 = vor.u32 4788187, %v1669_v14  ;;  %v6744_v15 = vand.u32 2147483647, %v5259_v11  ;;  %v1836_v46 = vsel %vm1834_vm12, %v1824_v47, 2102212464  ;;  %v1839_v57 = vsel %vm1831_vm11, %v1818_v24, %v1821_v30 }
 0x210   :  { %v4218_v50 = vmin.u32 %v1553_v0, %v6059_v22  ;;  %v1835_v53 = vsel %vm1831_vm11, %v1815_v51, %v1818_v24  ;;  %v1840_v63 = vsel %vm1834_vm12, %v1827_v56, 920167782  ;;  %v1843_v1 = vsel %vm1831_vm11, %v1821_v30, %v1824_v47  ;;  %v3896_v44 = vld [vmem:[%s6602_s4] sm:$0xff]  ;;  %v3897_v24 = vld [vmem:[%s6602_s4 + $0x8] sm:$0xff] }
 0x211   :  { %vm6082_vm13 = vcmp.le.f32.partialorder %v6744_v15, 0.7853982  ;;  %v1671_v48 = vand.u32 2147483647, %v1670_v31  ;;  %v1673_v43 = vcvt.s32.f32 %v1666_v60  ;;  %v1841_v9 = vsel %vm1833_vm15, %v1824_v47, %v1840_v63 }
 0x212   :  { %v1844_v58 = vsel %vm1834_vm12, %v1830_v61, 1326507024  ;;  %v1555_v12 = vclz %v4218_v50  ;;  %v1837_v14 = vsel %vm1833_vm15, %v1821_v30, %v1836_v46  ;;  %v1842_v15 = vsel %vm1832_vm10, %v1839_v57, %v1841_v9 }
 0x213   :  { %v1845_v13 = vsel %vm1833_vm15, %v1827_v56, %v1844_v58  ;;  %v1674_v51 = vmul.f32 %v1673_v43, %v1671_v48  ;;  %v6099_v47 = vmul.u32.u64.low %v6039_v28, %v1842_v15  ;;  %v6100_v61 = vmul.u32.u64.high %v6039_v28, %v1842_v15, %v6099_v47 }
 0x214   :  { %v1846_v60 = vsel %vm1832_vm10, %v1843_v1, %v1845_v13  ;;  %v4219_v30 = vadd.s32 4294967294, %v1555_v12  ;;  %v4225_v31 = vadd.s32 4294967169, %v6043_v10  ;;  %v1574_v57 = vsel %vm1489_vm8, %v1573_v42, %v1549_v25  ;;  %v3898_v10 = vld [vmem:[%s6602_s4 + $0x10] sm:$0xff] }
 0x215   :  { %v6103_v0 = vmul.u32.u64.low %v6039_v28, %v1846_v60  ;;  %v6104_v56 = vmul.u32.u64.high %v6039_v28, %v1846_v60, %v6103_v0  ;;  %v1675_v46 = vxor.u32 2147483648, %v1674_v51  ;;  %v1838_v50 = vsel %vm1832_vm10, %v1835_v53, %v1837_v14 }
 0x216   :  { %v4535_v63 = vpack.c.bf16 %v3897_v24, %v3896_v44  ;;  %v6114_v13 = vsel %vm6070_vm9, 0, %v6034_v45  ;;  %v1543_v1 = vadd.s32 %v5988_v21, %v6004_v35  ;;  %vm4220_vm2 = vcmp.lt.s32.totalorder %v4219_v30, 0 }
 0x217   :  { %v1705_v48 = vadd.s32 1, %v4225_v31  ;;  %v1676_v25 = vsel %vm1593_vm14, %v1675_v46, %v1674_v51  ;;  %v1558_v34 = vsel %vm4220_vm2, 0, %v4219_v30  ;;  %v1857_v42 = vadd.s32 1, %v6100_v61 }
 0x218   :  { %v1703_v44 = vor.u32 8388608, %v6064_v8  ;;  %4536 = vmatprep.subr.bf16.mxu1 %v4535_v63  ;;  %v1559_v45 = vsub.s32 32, %v1558_v34  ;;  %v1563_v53 = vsub.s32 4294967266, %v1558_v34  ;;  %v6127_v21 = vsel %vm6082_vm13, 0, %v1574_v57 }
 0x219   :  { %v1854_v35 = vmul.u32 %v6039_v28, %v1838_v50  ;;  %4538 = vmatpush3.bf16.msra.mxu1 %v4535_v63  ;;  %v1679_v43 = vsel %vm6070_vm9, %v5162_v32, %v1676_v25  ;;  %vm1856_vm3 = vc.u32 %v6104_v56, %v6099_v47  ;;  %vm1706_vm1 = vcmp.gt.s32.totalorder %v1705_v48, 0 }
 0x21a   :  { %4505 = vmatprep.subr.mxu1 %v3898_v10  ;;  %v332_v8 = vadd.s32 3, %v5151_v39  ;;  %v1560_v9 = vshll.u32 %v6059_v22, %v1558_v34  ;;  %v1561_v58 = vshrl.u32 %v1543_v1, %v1559_v45  ;;  %v1564_v12 = vadd.s32 127, %v1563_v53 }
 0x21b   :  { %v1858_v14 = vsel %vm1856_vm3, %v1857_v42, %v6100_v61  ;;  %vm1801_vm4 = vcmp.lt.s32.totalorder %v5344_v16, 0  ;;  %v1707_v15 = vsel %vm1706_vm1, %v1705_v48, 0  ;;  %v6138_v24 = vshll.u32 %v1703_v44, 8 }
 0x21c   :  { %v1859_v28 = vadd.s32 %v1858_v14, %v1854_v35  ;;  %v336_v6 = vxor.u32 2147483648, %v5280_v5  ;;  %4689 = vcosq.f32 %v1679_v43  ;;  %v1562_v51 = vor.u32 %v1561_v58, %v1560_v9 }
 0x21d   :  { %v1565_v60 = vshll.u32 %v1564_v12, 23  ;;  %v1709_v30 = vand.u32 31, %v1707_v15  ;;  %4506 = vmatpush3.msra.mxu1 %v3898_v10  ;;  %4691 = vsinq.f32 %v1679_v43  ;;  %v6142_v22 = vadd.s32 %v6099_v47, %v6104_v56 }
 0x21e   :  { %v1860_v0 = vadd.s32 536870912, %v1859_v28  ;;  %v6144_v31 = vand.u32 3, %v332_v8  ;;  %v1708_v46 = vshrl.u32 %v1707_v15, 5  ;;  %v339_v50 = vxor.u32 2147483648, %v5275_v40 }
 0x21f   :  { %v1566_v61 = vor.u32 4788187, %v1565_v60  ;;  %v1710_v57 = vsub.s32 32, %v1709_v30  ;;  %v1569_v63 = vcvt.s32.f32 %v1562_v51  ;;  %v6747_v1 = vand.u32 2147483647, %v5344_v16 }
 0x220   :  { %v1861_v10 = vshrl.u32 %v1860_v0, 30  ;;  %v1712_v25 = vshll.u32 %v6682_v59, %v1709_v30  ;;  %v1715_v47 = vshll.u32 %v6685_v36, %v1709_v30  ;;  %v1718_v44 = vshll.u32 %v6697_v55, %v1709_v30 }
 0x221   :  { %vm6149_vm0 = vcmp.le.f32.partialorder %v6747_v1, 0.7853982  ;;  %v1567_v56 = vand.u32 2147483647, %v1566_v61  ;;  %v1713_v34 = vshrl.u32 %v6685_v36, %v1710_v57  ;;  %v1716_v42 = vshrl.u32 %v6697_v55, %v1710_v57 }
 0x222   :  { %v1862_v45 = vshll.u32 %v1861_v10, 30  ;;  %v1885_v53 = vsub.s32 4, %v1861_v10  ;;  %v1719_v35 = vshrl.u32 %v6686_v23, %v1710_v57  ;;  %v1722_v43 = vshrl.u32 %v6701_v29, %v1710_v57 }
 0x223   :  { %vm335_vm14 = vcmp.eq.s32.totalorder %v6144_v31, 0  ;;  %v1570_v8 = vmul.f32 %v1569_v63, %v1567_v56  ;;  %v1711_v9 = vshrl.u32 %v6682_v59, %v1710_v57  ;;  %v1714_v58 = vor.u32 %v1713_v34, %v1712_v25 }
 0x224   :  { %v1721_v12 = vshll.u32 %v6686_v23, %v1709_v30  ;;  %v6163_v14 = vsub.s32 %v1859_v28, %v1862_v45  ;;  %v1717_v36 = vor.u32 %v1716_v42, %v1715_v47  ;;  %v1720_v15 = vor.u32 %v1719_v35, %v1718_v44 }
 0x225   :  { %v1724_v55 = vshll.u32 %v6701_v29, %v1709_v30  ;;  %vm338_vm5 = vcmp.eq.s32.totalorder %v6144_v31, 2  ;;  %v1571_v51 = vxor.u32 2147483648, %v1570_v8  ;;  %v1886_v60 = vsel %vm1801_vm4, %v1885_v53, %v1861_v10 }
 0x226   :  { %v1723_v0 = vor.u32 %v1722_v43, %v1721_v12  ;;  %v1725_v61 = vshrl.u32 %v6702_v4, %v1710_v57  ;;  %vm334_vm6 = vcmp.lt.s32.totalorder %v6144_v31, 2  ;;  %v1865_v59 = vsub.s32 0, %v6163_v14  ;;  %v6173_v23 = vpop.eup %4689 }
 0x227   :  { %vm1727_vm7 = vcmp.lt.s32.totalorder %v1708_v46, 1  ;;  %vm1729_vm9 = vcmp.lt.s32.totalorder %v1708_v46, 3  ;;  %vm1730_vm11 = vcmp.lt.s32.totalorder %v1708_v46, 4  ;;  %vm331_vm10 = vweird.f32 %v4835_v20  ;;  %v6179_v4 = vpop.eup %4691 }
 0x228   :  { %v1572_v29 = vsel %vm1489_vm8, %v1571_v51, %v1570_v8  ;;  %v1726_v28 = vor.u32 %v1725_v61, %v1724_v55  ;;  %v1731_v30 = vsel %vm1727_vm7, %v1711_v9, %v1714_v58  ;;  %v1732_v63 = vsel %vm1730_vm11, %v1720_v15, 2102212464 }
 0x229   :  { %v1575_v57 = vsel %vm6082_vm13, %v5259_v11, %v1572_v29  ;;  %v4230_v1 = vmin.u32 %v1865_v59, %v6163_v14  ;;  %v1733_v10 = vsel %vm1729_vm9, %v1717_v36, %v1732_v63  ;;  %v1735_v25 = vsel %vm1727_vm7, %v1714_v58, %v1717_v36 }
 0x22a   :  { %v6189_v47 = vsel %vm6149_vm0, 0, %v1886_v60  ;;  %vm1728_vm8 = vcmp.lt.s32.totalorder %v1708_v46, 2  ;;  %v1736_v56 = vsel %vm1730_vm11, %v1723_v0, 920167782  ;;  %v1739_v34 = vsel %vm1727_vm7, %v1717_v36, %v1720_v15 }
 0x22b   :  { %4693 = vcosq.f32 %v1575_v57  ;;  %v1867_v42 = vclz %v4230_v1  ;;  %v1737_v33 = vsel %vm1729_vm9, %v1720_v15, %v1736_v56  ;;  %v1740_v44 = vsel %vm1730_vm11, %v1726_v28, 1326507024 }
 0x22c   :  { %v1734_v45 = vsel %vm1728_vm8, %v1731_v30, %v1733_v10  ;;  %v1738_v53 = vsel %vm1728_vm8, %v1735_v25, %v1737_v33  ;;  %v1741_v35 = vsel %vm1729_vm9, %v1723_v0, %v1740_v44  ;;  %v337_v43 = vsel %vm335_vm14, %v5275_v40, %v336_v6 }
 0x22d   :  { %v4231_v8 = vadd.s32 4294967294, %v1867_v42  ;;  %v1742_v9 = vsel %vm1728_vm8, %v1739_v34, %v1741_v35  ;;  %v6202_v58 = vmul.u32.u64.low %v6138_v24, %v1738_v53  ;;  %v6203_v12 = vmul.u32.u64.high %v6138_v24, %v1738_v53, %v6202_v58 }
 0x22e   :  { %v6207_v36 = vmul.u32.u64.low %v6138_v24, %v1742_v9  ;;  %v6208_v15 = vmul.u32.u64.high %v6138_v24, %v1742_v9, %v6207_v36  ;;  %v340_v46 = vsel %vm338_vm5, %v339_v50, %v5280_v5  ;;  %vm1906_vm12 = vcmask 195584  }
 0x22f   :  { %4695 = vsinq.f32 %v1575_v57  ;;  %vm4232_vm13 = vcmp.lt.s32.totalorder %v4231_v8, 0  ;;  %v341_v55 = vsel %vm334_vm6, %v337_v43, %v340_v46  ;;  %v2341_v51 = vand.u32 3, %v5151_v39 }
 0x230   :  { %vm435_vm15 = vweird.f32 %v4831_v17  ;;  %v1870_v60 = vsel %vm4232_vm13, 0, %v4231_v8  ;;  %v1750_v0 = vmul.u32 %v6138_v24, %v1734_v45  ;;  %v342_v61 = vsel %vm331_vm10, nan, %v341_v55  ;;  %v6753_v45 = vld [vmem:[#allocation9_spill] sm:$0xff] }
 0x231   :  { %v440_v59 = vxor.u32 2147483648, %v5190_v62  ;;  %v1871_v29 = vsub.s32 32, %v1870_v60  ;;  %v1875_v28 = vsub.s32 4294967266, %v1870_v60  ;;  %v1753_v30 = vadd.s32 1, %v6203_v12  ;;  %4451 = vmatprep.mubr.msk.f32.mxu0 %vm1906_vm12, %v342_v61  ;;  %v6755_v61 = vld [vmem:[#allocation18_spill] sm:$0xff] }
 0x232   :  { %vm438_vm2 = vcmp.lt.s32.totalorder %v5069_v49, 2  ;;  %v1872_v39 = vshll.u32 %v6163_v14, %v1870_v60  ;;  %vm1752_vm3 = vc.u32 %v6208_v15, %v6202_v58  ;;  %vm2343_vm1 = vcmp.eq.s32.totalorder %v2341_v51, 0 }
 0x233   :  { %vm439_vm14 = vcmp.eq.s32.totalorder %v5069_v49, 0  ;;  %v1873_v24 = vshrl.u32 %v6142_v22, %v1871_v29  ;;  %v1876_v31 = vadd.s32 127, %v1875_v28  ;;  %vm1697_vm5 = vcmp.lt.s32.totalorder %v5448_v3, 0  ;;  %v6756_v29 = vld [vmem:[#allocation17_spill] sm:$0xff] }
 0x234   :  { %v1754_v63 = vsel %vm1752_vm3, %v1753_v30, %v6203_v12  ;;  %v2345_v57 = vsel %vm2343_vm1, %v5275_v40, %v336_v6  ;;  %v6750_v1 = vand.u32 2147483647, %v5448_v3  ;;  %vm2342_vm7 = vcmp.lt.s32.totalorder %v2341_v51, 2 }
 0x235   :  { %v1755_v10 = vadd.s32 %v1754_v63, %v1750_v0  ;;  %vm2346_vm9 = vcmp.eq.s32.totalorder %v2341_v51, 2  ;;  %v441_v22 = vsel %vm439_vm14, %v5122_v2, %v440_v59  ;;  %v6243_v25 = vpop.eup %4693  ;;  %v1874_v56 = vor.u32 %v1873_v24, %v1872_v39  ;;  %v6754_v51 = vld [vmem:[#allocation12_spill] sm:$0xff] }
 0x236   :  { %vm6238_vm6 = vcmp.le.f32.partialorder %v6750_v1, 0.7853982  ;;  %v1877_v34 = vshll.u32 %v1876_v31, 23  ;;  %v2348_v42 = vsel %vm2346_vm9, %v339_v50, %v5280_v5  ;;  %v443_v6 = vxor.u32 2147483648, %v5122_v2 }
 0x237   :  { %v1756_v33 = vadd.s32 536870912, %v1755_v10  ;;  %v2349_v44 = vsel %vm2342_vm7, %v2345_v57, %v2348_v42  ;;  %vm442_vm11 = vcmp.eq.s32.totalorder %v5069_v49, 2  ;;  %vm2445_vm8 = vcmp.lt.s32.totalorder %v6753_v45, 2  ;;  %v6757_v57 = vld [vmem:[#allocation3_spill] sm:$0xff] }
 0x238   :  { %v1878_v53 = vor.u32 4788187, %v1877_v34  ;;  %v2350_v35 = vsel %vm331_vm10, nan, %v2349_v44  ;;  %v444_v43 = vsel %vm442_vm11, %v443_v6, %v5190_v62  ;;  %vm2446_vm13 = vcmp.eq.s32.totalorder %v6753_v45, 0 }
 0x239   :  { %v1757_v8 = vshrl.u32 %v1756_v33, 30  ;;  %4507 = vmatprep.mubr.msk.f32.mxu1 %vm1906_vm12, %v2350_v35  ;;  %v445_v40 = vsel %vm438_vm2, %v441_v22, %v444_v43  ;;  %v2448_v5 = vsel %vm2446_vm13, %v5122_v2, %v440_v59  ;;  %vm2449_vm3 = vcmp.eq.s32.totalorder %v6753_v45, 2  ;;  %v6260_v50 = vpop.eup %4695 }
 0x23a   :  { %v1879_v9 = vand.u32 2147483647, %v1878_v53  ;;  %v1881_v12 = vcvt.s32.f32 %v1874_v56  ;;  %v446_v20 = vsel %vm435_vm15, nan, %v445_v40  ;;  %v2451_v36 = vsel %vm2449_vm3, %v443_v6, %v5190_v62 }
 0x23b   :  { %v1758_v46 = vshll.u32 %v1757_v8, 30  ;;  %v1781_v55 = vsub.s32 4, %v1757_v8  ;;  %4452 = vmatmul.mubr.msk.f32.vlgmr.msra.gmra.mrb[16].mxu0 %vm1906_vm12, %v446_v20  ;;  %v2452_v49 = vsel %vm2445_vm8, %v2448_v5, %v2451_v36  ;;  %v540_v2 = vadd.s32 3, %v6754_v51  ;;  %v6761_v5 = vld [vmem:[#allocation13_spill] sm:$0xff] }
 0x23c   :  { %v1882_v60 = vmul.f32 %v1881_v12, %v1879_v9  ;;  %v2453_v0 = vsel %vm435_vm15, nan, %v2452_v49  ;;  %v544_v59 = vxor.u32 2147483648, %v6755_v61  ;;  %v547_v28 = vxor.u32 2147483648, %v6756_v29 }
 0x23d   :  { %v6273_v30 = vsub.s32 %v1755_v10, %v1758_v46  ;;  %v1782_v62 = vsel %vm1697_vm5, %v1781_v55, %v1757_v8  ;;  %4508 = vmatmul.mubr.msk.f32.vlgmr.msra.gmra.mrb[0].mxu1 %vm1906_vm12, %v2453_v0  ;;  %v541_v39 = vand.u32 3, %v540_v2  ;;  %v2547_v24 = vand.u32 3, %v6754_v51  ;;  %v6758_v10 = vld [vmem:[#allocation11_spill] sm:$0xff]  ;;  %v6760_v8 = vld [vmem:[#allocation14_spill] sm:$0xff] }
 0x23e   :  { %v1883_v31 = vxor.u32 2147483648, %v1882_v60  ;;  %v1751_v63 = vadd.s32 %v6202_v58, %v6208_v15  ;;  %v6283_v17 = vsel %vm6238_vm6, 0, %v1782_v62  ;;  %vm539_vm10 = vweird.f32 %v6757_v57  ;;  %v6759_v15 = vld [vmem:[#allocation2_spill] sm:$0xff]  ;;  %v6762_v62 = vld [vmem:[#allocation16_spill] sm:$0xff] }
 0x23f   :  { %v1761_v1 = vsub.s32 0, %v6273_v30  ;;  %vm543_vm15 = vcmp.eq.s32.totalorder %v541_v39, 0  ;;  %vm546_vm2 = vcmp.eq.s32.totalorder %v541_v39, 2  ;;  %v644_v22 = vadd.s32 3, %v6758_v10 }
 0x240   :  { %v1884_v56 = vsel %vm1801_vm4, %v1883_v31, %v1882_v60  ;;  %vm542_vm1 = vcmp.lt.s32.totalorder %v541_v39, 2  ;;  %v545_v34 = vsel %vm543_vm15, %v6756_v29, %v544_v59  ;;  %v548_v58 = vsel %vm546_vm2, %v547_v28, %v6755_v61 }
 0x241   :  { %vm643_vm14 = vweird.f32 %v6759_v15  ;;  %v6296_v42 = vsel %vm6149_vm0, %v5344_v16, %v1884_v56  ;;  %v4226_v6 = vmin.u32 %v1761_v1, %v6273_v30  ;;  %v549_v33 = vsel %vm542_vm1, %v545_v34, %v548_v58  ;;  %v6763_v56 = vld [vmem:[#allocation4_spill] sm:$0xff]  ;;  %v6764_v34 = vld [vmem:[#allocation15_spill] sm:$0xff] }
 0x242   :  { %vm2549_vm7 = vcmp.eq.s32.totalorder %v2547_v24, 0  ;;  %v550_v44 = vsel %vm539_vm10, nan, %v549_v33  ;;  %vm2548_vm4 = vcmp.lt.s32.totalorder %v2547_v24, 2  ;;  %vm2552_vm9 = vcmp.eq.s32.totalorder %v2547_v24, 2 }
 0x243   :  { %v2551_v45 = vsel %vm2549_vm7, %v6756_v29, %v544_v59  ;;  %4697 = vcosq.f32 %v6296_v42  ;;  %v1763_v53 = vclz %v4226_v6  ;;  %4454 = vmatprep.mubr.msk.f32.mxu0 %vm1906_vm12, %v550_v44  ;;  %v2554_v48 = vsel %vm2552_vm9, %v547_v28, %v6755_v61 }
 0x244   :  { %v645_v35 = vand.u32 3, %v644_v22  ;;  %v2555_v43 = vsel %vm2548_vm4, %v2551_v45, %v2554_v48  ;;  %v648_v40 = vxor.u32 2147483648, %v6760_v8  ;;  %v651_v9 = vxor.u32 2147483648, %v6761_v5 }
 0x245   :  { %v2650_v12 = vand.u32 3, %v6758_v10  ;;  %v4227_v20 = vadd.s32 4294967294, %v1763_v53  ;;  %v2556_v36 = vsel %vm539_vm10, nan, %v2555_v43  ;;  %vm747_vm10 = vweird.f32 %v4850_v38 }
 0x246   :  { %vm646_vm0 = vcmp.lt.s32.totalorder %v645_v35, 2  ;;  %vm647_vm11 = vcmp.eq.s32.totalorder %v645_v35, 0  ;;  %4510 = vmatprep.mubr.msk.f32.mxu1 %vm1906_vm12, %v2556_v36  ;;  %vm650_vm8 = vcmp.eq.s32.totalorder %v645_v35, 2  ;;  %v748_v39 = vadd.s32 3, %v6762_v62 }
 0x247   :  { %v649_v46 = vsel %vm647_vm11, %v6761_v5, %v648_v40  ;;  %vm2651_vm13 = vcmp.lt.s32.totalorder %v2650_v12, 2  ;;  %vm2652_vm3 = vcmp.eq.s32.totalorder %v2650_v12, 0  ;;  %vm4228_vm15 = vcmp.lt.s32.totalorder %v4227_v20, 0 }
 0x248   :  { %v652_v55 = vsel %vm650_vm8, %v651_v9, %v6760_v8  ;;  %v2654_v49 = vsel %vm2652_vm3, %v6761_v5, %v648_v40  ;;  %vm2655_vm2 = vcmp.eq.s32.totalorder %v2650_v12, 2  ;;  %v1766_v51 = vsel %vm4228_vm15, 0, %v4227_v20 }
 0x249   :  { %v653_v2 = vsel %vm646_vm0, %v649_v46, %v652_v55  ;;  %v2657_v60 = vsel %vm2655_vm2, %v651_v9, %v6760_v8  ;;  %v1767_v0 = vsub.s32 32, %v1766_v51  ;;  %v1768_v61 = vshll.u32 %v6273_v30, %v1766_v51 }
 0x24a   :  { %v1771_v59 = vsub.s32 4294967266, %v1766_v51  ;;  %v654_v29 = vsel %vm643_vm14, nan, %v653_v2  ;;  %v2658_v28 = vsel %vm2651_vm13, %v2654_v49, %v2657_v60  ;;  %v752_v24 = vxor.u32 2147483648, %v5683_v41 }
 0x24b   :  { %4455 = vmatmul.mubr.msk.f32.gmra.mrb[18].mxu0 %vm1906_vm12, %v654_v29  ;;  %v755_v31 = vxor.u32 2147483648, %v5654_v52  ;;  %v1769_v57 = vshrl.u32 %v1751_v63, %v1767_v0  ;;  %v2659_v10 = vsel %vm643_vm14, nan, %v2658_v28  ;;  %v2753_v30 = vand.u32 3, %v6762_v62 }
 0x24c   :  { %v1772_v1 = vadd.s32 127, %v1771_v59  ;;  %4511 = vmatmul.mubr.msk.f32.gmra.mrb[2].mxu1 %vm1906_vm12, %v2659_v10  ;;  %v749_v22 = vand.u32 3, %v748_v39  ;;  %vm851_vm1 = vweird.f32 %v6763_v56  ;;  %v852_v58 = vadd.s32 3, %v6764_v34  ;;  %v6765_v39 = vld [vmem:[#allocation19_spill] sm:$0xff] }
 0x24d   :  { %v856_v6 = vxor.u32 2147483648, %v5543_v37  ;;  %v6330_v33 = vpop.eup %4697  ;;  %v1770_v44 = vor.u32 %v1769_v57, %v1768_v61  ;;  %vm2754_vm7 = vcmp.lt.s32.totalorder %v2753_v30, 2  ;;  %vm2755_vm4 = vcmp.eq.s32.totalorder %v2753_v30, 0 }
 0x24e   :  { %v1773_v45 = vshll.u32 %v1772_v1, 23  ;;  %vm750_vm9 = vcmp.lt.s32.totalorder %v749_v22, 2  ;;  %vm751_vm0 = vcmp.eq.s32.totalorder %v749_v22, 0  ;;  %vm754_vm14 = vcmp.eq.s32.totalorder %v749_v22, 2 }
 0x24f   :  { %v2757_v63 = vsel %vm2755_vm4, %v5654_v52, %v752_v24  ;;  %v1777_v53 = vcvt.s32.f32 %v1770_v44  ;;  %v753_v48 = vsel %vm751_vm0, %v5654_v52, %v752_v24  ;;  %v756_v35 = vsel %vm754_vm14, %v755_v31, %v5683_v41 }
 0x250   :  { %v1774_v15 = vor.u32 4788187, %v1773_v45  ;;  %v757_v43 = vsel %vm750_vm9, %v753_v48, %v756_v35  ;;  %vm2758_vm11 = vcmp.eq.s32.totalorder %v2753_v30, 2  ;;  %v853_v8 = vand.u32 3, %v852_v58 }
 0x251   :  { %v859_v40 = vxor.u32 2147483648, %v5492_v19  ;;  %v758_v9 = vsel %vm747_vm10, nan, %v757_v43  ;;  %v2760_v12 = vsel %vm2758_vm11, %v755_v31, %v5683_v41  ;;  %v2856_v20 = vand.u32 3, %v6764_v34  ;;  %v6766_v31 = vld [vmem:[#allocation5_spill] sm:$0xff] }
 0x252   :  { %v1775_v5 = vand.u32 2147483647, %v1774_v15  ;;  %4457 = vmatprep.mubr.msk.f32.mxu0 %vm1906_vm12, %v758_v9  ;;  %v2761_v36 = vsel %vm2754_vm7, %v2757_v63, %v2760_v12  ;;  %vm854_vm8 = vcmp.lt.s32.totalorder %v853_v8, 2  ;;  %vm855_vm13 = vcmp.eq.s32.totalorder %v853_v8, 0 }
 0x253   :  { %vm858_vm3 = vcmp.eq.s32.totalorder %v853_v8, 2  ;;  %v2762_v46 = vsel %vm747_vm10, nan, %v2761_v36  ;;  %v857_v55 = vsel %vm855_vm13, %v5492_v19, %v856_v6  ;;  %vm2857_vm15 = vcmp.lt.s32.totalorder %v2856_v20, 2  ;;  %v6769_v8 = vld [vmem:[#allocation27_spill] sm:$0xff] }
 0x254   :  { %v1778_v52 = vmul.f32 %v1777_v53, %v1775_v5  ;;  %v860_v49 = vsel %vm858_vm3, %v859_v40, %v5543_v37  ;;  %4513 = vmatprep.mubr.msk.f32.mxu1 %vm1906_vm12, %v2762_v46  ;;  %vm2858_vm2 = vcmp.eq.s32.totalorder %v2856_v20, 0  ;;  %vm2861_vm4 = vcmp.eq.s32.totalorder %v2856_v20, 2  ;;  %v6768_v53 = vld [vmem:[#allocation22_spill] sm:$0xff]  ;;  %v6771_v20 = vld [vmem:[#allocation7_spill] sm:$0xff] }
 0x255   :  { %v861_v41 = vsel %vm854_vm8, %v857_v55, %v860_v49  ;;  %v2860_v60 = vsel %vm2858_vm2, %v5492_v19, %v856_v6  ;;  %v2863_v0 = vsel %vm2861_vm4, %v859_v40, %v5543_v37  ;;  %4699 = vsinq.f32 %v6296_v42  ;;  %v6767_v6 = vld [vmem:[#allocation21_spill] sm:$0xff]  ;;  %v6770_v5 = vld [vmem:[#allocation26_spill] sm:$0xff]  ;;  %v6772_v49 = vld [vmem:[#allocation20_spill] sm:$0xff] }
 0x256   :  { %v1779_v51 = vxor.u32 2147483648, %v1778_v52  ;;  %v862_v2 = vsel %vm851_vm1, nan, %v861_v41  ;;  %v2864_v38 = vsel %vm2857_vm15, %v2860_v60, %v2863_v0  ;;  %v956_v61 = vadd.s32 3, %v5629_v27 }
 0x257   :  { %4458 = vmatmul.mubr.msk.f32.gmra.mrb[20].mxu0 %vm1906_vm12, %v862_v2  ;;  %v960_v59 = vxor.u32 2147483648, %v5893_v26  ;;  %v2865_v28 = vsel %vm851_vm1, nan, %v2864_v38  ;;  %v963_v62 = vxor.u32 2147483648, %v5722_v7  ;;  %v2959_v19 = vand.u32 3, %v5629_v27  ;;  %v6774_v2 = vld [vmem:[#allocation24_spill] sm:$0xff] }
 0x258   :  { %v1780_v29 = vsel %vm1697_vm5, %v1779_v51, %v1778_v52  ;;  %4514 = vmatmul.mubr.msk.f32.gmra.mrb[4].mxu1 %vm1906_vm12, %v2865_v28  ;;  %vm955_vm10 = vweird.f32 %v4864_v54  ;;  %v957_v42 = vand.u32 3, %v956_v61  ;;  %v1060_v24 = vadd.s32 3, %v6765_v39 }
 0x259   :  { %v1783_v37 = vsel %vm6238_vm6, %v5448_v3, %v1780_v29  ;;  %vm2960_vm5 = vcmp.lt.s32.totalorder %v2959_v19, 2  ;;  %vm2961_vm7 = vcmp.eq.s32.totalorder %v2959_v19, 0  ;;  %vm1059_vm1 = vweird.f32 %v6766_v31 }
 0x25a   :  { %4701 = vcosq.f32 %v1783_v37  ;;  %vm958_vm9 = vcmp.lt.s32.totalorder %v957_v42, 2  ;;  %vm959_vm0 = vcmp.eq.s32.totalorder %v957_v42, 0  ;;  %vm962_vm14 = vcmp.eq.s32.totalorder %v957_v42, 2 }
 0x25b   :  { %vm2964_vm11 = vcmp.eq.s32.totalorder %v2959_v19, 2  ;;  %v961_v27 = vsel %vm959_vm0, %v5722_v7, %v960_v59  ;;  %v964_v14 = vsel %vm962_vm14, %v963_v62, %v5893_v26  ;;  %v2963_v57 = vsel %vm2961_vm7, %v5722_v7, %v960_v59 }
 0x25c   :  { %v2966_v1 = vsel %vm2964_vm11, %v963_v62, %v5893_v26  ;;  %v965_v10 = vsel %vm958_vm9, %v961_v27, %v964_v14  ;;  %v1061_v22 = vand.u32 3, %v1060_v24  ;;  %v1064_v56 = vxor.u32 2147483648, %v5713_v18 }
 0x25d   :  { %v2967_v30 = vsel %vm2960_vm5, %v2963_v57, %v2966_v1  ;;  %v966_v34 = vsel %vm955_vm10, nan, %v965_v10  ;;  %v1067_v44 = vxor.u32 2147483648, %v6767_v6  ;;  %v3062_v45 = vand.u32 3, %v6765_v39  ;;  %v6776_v1 = vld [vmem:[#allocation28_spill] sm:$0xff] }
 0x25e   :  { %v2968_v58 = vsel %vm955_vm10, nan, %v2967_v30  ;;  %4703 = vsinq.f32 %v1783_v37  ;;  %4460 = vmatprep.mubr.msk.f32.mxu0 %vm1906_vm12, %v966_v34  ;;  %vm1062_vm6 = vcmp.lt.s32.totalorder %v1061_v22, 2  ;;  %vm1063_vm8 = vcmp.eq.s32.totalorder %v1061_v22, 0  ;;  %v6775_v37 = vld [vmem:[#allocation6_spill] sm:$0xff] }
 0x25f   :  { %4516 = vmatprep.mubr.msk.f32.mxu1 %vm1906_vm12, %v2968_v58  ;;  %vm1066_vm13 = vcmp.eq.s32.totalorder %v1061_v22, 2  ;;  %v1065_v7 = vsel %vm1063_vm8, %v6767_v6, %v1064_v56  ;;  %vm3063_vm3 = vcmp.lt.s32.totalorder %v3062_v45, 2  ;;  %vm3064_vm15 = vcmp.eq.s32.totalorder %v3062_v45, 0  ;;  %v6383_v54 = vpop.eup %4699  ;;  %v6778_v58 = vld [vmem:[#allocation31_spill] sm:$0xff] }
 0x260   :  { %v1068_v26 = vsel %vm1066_vm13, %v1067_v44, %v5713_v18  ;;  %v3066_v15 = vsel %vm3064_vm15, %v6767_v6, %v1064_v56  ;;  %vm3067_vm2 = vcmp.eq.s32.totalorder %v3062_v45, 2  ;;  %v1164_v48 = vadd.s32 3, %v6768_v53  ;;  %v6777_v56 = vld [vmem:[#allocation32_spill] sm:$0xff]  ;;  %v6779_v45 = vld [vmem:[#allocation10_spill] sm:$0xff] }
 0x261   :  { %v1069_v63 = vsel %vm1062_vm6, %v1065_v7, %v1068_v26  ;;  %v3069_v43 = vsel %vm3067_vm2, %v1067_v44, %v5713_v18  ;;  %v1168_v40 = vxor.u32 2147483648, %v6769_v8  ;;  %v1171_v9 = vxor.u32 2147483648, %v6770_v5  ;;  %v6773_v18 = vld [vmem:[#allocation25_spill] sm:$0xff] }
 0x262   :  { %v1070_v35 = vsel %vm1059_vm1, nan, %v1069_v63  ;;  %v3070_v12 = vsel %vm3063_vm3, %v3066_v15, %v3069_v43  ;;  %vm1163_vm4 = vweird.f32 %v6771_v20  ;;  %v1165_v36 = vand.u32 3, %v1164_v48  ;;  %v6780_v15 = vld [vmem:[#allocation23_spill] sm:$0xff]  ;;  %v6781_v48 = vld [vmem:[#allocation30_spill] sm:$0xff]  ;;  %v6782_v43 = vld [vmem:[#allocation29_spill] sm:$0xff] }
 0x263   :  { %4461 = vmatmul.mubr.msk.f32.gmra.mrb[22].mxu0 %vm1906_vm12, %v1070_v35  ;;  %v3165_v52 = vand.u32 3, %v6768_v53  ;;  %v3071_v55 = vsel %vm1059_vm1, nan, %v3070_v12  ;;  %v1268_v41 = vadd.s32 3, %v6772_v49  ;;  %v1272_v51 = vxor.u32 2147483648, %v6773_v18 }
 0x264   :  { %v6395_v46 = vpop.eup %4701  ;;  %v1275_v60 = vxor.u32 2147483648, %v6774_v2  ;;  %4517 = vmatmul.mubr.msk.f32.gmra.mrb[6].mxu1 %vm1906_vm12, %v3071_v55  ;;  %vm1166_vm10 = vcmp.lt.s32.totalorder %v1165_v36, 2  ;;  %vm1167_vm5 = vcmp.eq.s32.totalorder %v1165_v36, 0  ;;  %vm1170_vm7 = vcmp.eq.s32.totalorder %v1165_v36, 2 }
 0x265   :  { %vm3166_vm9 = vcmp.lt.s32.totalorder %v3165_v52, 2  ;;  %v1169_v0 = vsel %vm1167_vm5, %v6770_v5, %v1168_v40  ;;  %v1172_v38 = vsel %vm1170_vm7, %v1171_v9, %v6769_v8  ;;  %vm3167_vm0 = vcmp.eq.s32.totalorder %v3165_v52, 0 }
 0x266   :  { %vm3170_vm14 = vcmp.eq.s32.totalorder %v3165_v52, 2  ;;  %v1173_v61 = vsel %vm1166_vm10, %v1169_v0, %v1172_v38  ;;  %v3169_v59 = vsel %vm3167_vm0, %v6770_v5, %v1168_v40  ;;  %v1269_v28 = vand.u32 3, %v1268_v41 }
 0x267   :  { %v3172_v29 = vsel %vm3170_vm14, %v1171_v9, %v6769_v8  ;;  %v1174_v62 = vsel %vm1163_vm4, nan, %v1173_v61  ;;  %vm1267_vm1 = vweird.f32 %v6775_v37  ;;  %v3268_v42 = vand.u32 3, %v6772_v49  ;;  %v6783_v49 = vld [vmem:[#allocation8_spill] sm:$0xff] }
 0x268   :  { %v3173_v19 = vsel %vm3166_vm9, %v3169_v59, %v3172_v29  ;;  %v6411_v39 = vpop.eup %4703  ;;  %4463 = vmatprep.mubr.msk.f32.mxu0 %vm1906_vm12, %v1174_v62  ;;  %vm1270_vm11 = vcmp.lt.s32.totalorder %v1269_v28, 2  ;;  %vm1271_vm6 = vcmp.eq.s32.totalorder %v1269_v28, 0  ;;  %vm1274_vm8 = vcmp.eq.s32.totalorder %v1269_v28, 2 }
 0x269   :  { %v3174_v24 = vsel %vm1163_vm4, nan, %v3173_v19  ;;  %v1273_v31 = vsel %vm1271_vm6, %v6774_v2, %v1272_v51  ;;  %v1276_v27 = vsel %vm1274_vm8, %v1275_v60, %v6773_v18  ;;  %vm3269_vm13 = vcmp.lt.s32.totalorder %v3268_v42, 2 }
 0x26a   :  { %4519 = vmatprep.mubr.msk.f32.mxu1 %vm1906_vm12, %v3174_v24  ;;  %vm3270_vm3 = vcmp.eq.s32.totalorder %v3268_v42, 0  ;;  %v1277_v14 = vsel %vm1270_vm11, %v1273_v31, %v1276_v27  ;;  %vm3273_vm15 = vcmp.eq.s32.totalorder %v3268_v42, 2  ;;  %v1372_v10 = vadd.s32 3, %v6776_v1 }
 0x26b   :  { %v3272_v57 = vsel %vm3270_vm3, %v6774_v2, %v1272_v51  ;;  %v1278_v30 = vsel %vm1267_vm1, nan, %v1277_v14  ;;  %v3275_v22 = vsel %vm3273_vm15, %v1275_v60, %v6773_v18  ;;  %v1376_v34 = vxor.u32 2147483648, %v6777_v56 }
 0x26c   :  { %v1379_v6 = vxor.u32 2147483648, %v6778_v58  ;;  %4464 = vmatmul.mubr.msk.f32.gmra.mrb[24].mxu0 %vm1906_vm12, %v1278_v30  ;;  %v3276_v44 = vsel %vm3269_vm13, %v3272_v57, %v3275_v22  ;;  %vm1371_vm2 = vweird.f32 %v6779_v45  ;;  %v1373_v7 = vand.u32 3, %v1372_v10 }
 0x26d   :  { %v3371_v26 = vand.u32 3, %v6776_v1  ;;  %v3277_v63 = vsel %vm1267_vm1, nan, %v3276_v44  ;;  %v1476_v53 = vadd.s32 3, %v6780_v15  ;;  %v1480_v35 = vxor.u32 2147483648, %v6781_v48 }
 0x26e   :  { %v1483_v8 = vxor.u32 2147483648, %v6782_v43  ;;  %4520 = vmatmul.mubr.msk.f32.gmra.mrb[8].mxu1 %vm1906_vm12, %v3277_v63  ;;  %vm1374_vm4 = vcmp.lt.s32.totalorder %v1373_v7, 2  ;;  %vm1375_vm10 = vcmp.eq.s32.totalorder %v1373_v7, 0  ;;  %vm1378_vm5 = vcmp.eq.s32.totalorder %v1373_v7, 2 }
 0x26f   :  { %vm3372_vm7 = vcmp.lt.s32.totalorder %v3371_v26, 2  ;;  %v1377_v40 = vsel %vm1375_vm10, %v6778_v58, %v1376_v34  ;;  %v1380_v5 = vsel %vm1378_vm5, %v1379_v6, %v6777_v56  ;;  %vm3373_vm9 = vcmp.eq.s32.totalorder %v3371_v26, 0 }
 0x270   :  { %vm3376_vm0 = vcmp.eq.s32.totalorder %v3371_v26, 2  ;;  %v1381_v9 = vsel %vm1374_vm4, %v1377_v40, %v1380_v5  ;;  %v3375_v12 = vsel %vm3373_vm9, %v6778_v58, %v1376_v34  ;;  %v1477_v36 = vand.u32 3, %v1476_v53 }
 0x271   :  { %v3378_v20 = vsel %vm3376_vm0, %v1379_v6, %v6777_v56  ;;  %v1382_v52 = vsel %vm1371_vm2, nan, %v1381_v9  ;;  %vm1475_vm14 = vweird.f32 %v6783_v49  ;;  %v3474_v41 = vand.u32 3, %v6780_v15 }
 0x272   :  { %v3379_v55 = vsel %vm3372_vm7, %v3375_v12, %v3378_v20  ;;  %4466 = vmatprep.mubr.msk.f32.mxu0 %vm1906_vm12, %v1382_v52  ;;  %vm1478_vm1 = vcmp.lt.s32.totalorder %v1477_v36, 2  ;;  %vm1479_vm11 = vcmp.eq.s32.totalorder %v1477_v36, 0  ;;  %vm1482_vm6 = vcmp.eq.s32.totalorder %v1477_v36, 2 }
 0x273   :  { %v3380_v18 = vsel %vm1371_vm2, nan, %v3379_v55  ;;  %v1481_v51 = vsel %vm1479_vm11, %v6782_v43, %v1480_v35  ;;  %v1484_v2 = vsel %vm1482_vm6, %v1483_v8, %v6781_v48  ;;  %vm3475_vm8 = vcmp.lt.s32.totalorder %v3474_v41, 2 }
 0x274   :  { %4522 = vmatprep.mubr.msk.f32.mxu1 %vm1906_vm12, %v3380_v18  ;;  %vm3476_vm13 = vcmp.eq.s32.totalorder %v3474_v41, 0  ;;  %v1485_v60 = vsel %vm1478_vm1, %v1481_v51, %v1484_v2  ;;  %vm3479_vm3 = vcmp.eq.s32.totalorder %v3474_v41, 2  ;;  %v1580_v38 = vadd.s32 3, %v6127_v21 }
 0x275   :  { %v3478_v0 = vsel %vm3476_vm13, %v6782_v43, %v1480_v35  ;;  %v1486_v61 = vsel %vm1475_vm14, nan, %v1485_v60  ;;  %v3481_v59 = vsel %vm3479_vm3, %v1483_v8, %v6781_v48  ;;  %v1584_v29 = vxor.u32 2147483648, %v6260_v50 }
 0x276   :  { %v1587_v28 = vxor.u32 2147483648, %v6243_v25  ;;  %4467 = vmatmul.mubr.msk.f32.gmra.mrb[26].mxu0 %vm1906_vm12, %v1486_v61  ;;  %v3482_v62 = vsel %vm3475_vm8, %v3478_v0, %v3481_v59  ;;  %vm1579_vm15 = vweird.f32 %v5259_v11  ;;  %v1581_v19 = vand.u32 3, %v1580_v38 }
 0x277   :  { %v3577_v37 = vand.u32 3, %v6127_v21  ;;  %v3483_v42 = vsel %vm1475_vm14, nan, %v3482_v62  ;;  %v1684_v24 = vadd.s32 3, %v6114_v13  ;;  %v1688_v31 = vxor.u32 2147483648, %v6179_v4 }
 0x278   :  { %v1691_v27 = vxor.u32 2147483648, %v6173_v23  ;;  %4523 = vmatmul.mubr.msk.f32.gmra.mrb[10].mxu1 %vm1906_vm12, %v3483_v42  ;;  %vm1582_vm2 = vcmp.lt.s32.totalorder %v1581_v19, 2  ;;  %vm1583_vm4 = vcmp.eq.s32.totalorder %v1581_v19, 0  ;;  %vm1586_vm10 = vcmp.eq.s32.totalorder %v1581_v19, 2 }
 0x279   :  { %vm3578_vm5 = vcmp.lt.s32.totalorder %v3577_v37, 2  ;;  %v1585_v14 = vsel %vm1583_vm4, %v6243_v25, %v1584_v29  ;;  %v1588_v57 = vsel %vm1586_vm10, %v1587_v28, %v6260_v50  ;;  %vm3579_vm7 = vcmp.eq.s32.totalorder %v3577_v37, 0 }
 0x27a   :  { %vm3582_vm9 = vcmp.eq.s32.totalorder %v3577_v37, 2  ;;  %v1589_v21 = vsel %vm1582_vm2, %v1585_v14, %v1588_v57  ;;  %v3581_v1 = vsel %vm3579_vm7, %v6243_v25, %v1584_v29  ;;  %v1685_v30 = vand.u32 3, %v1684_v24 }
 0x27b   :  { %v3584_v10 = vsel %vm3582_vm9, %v1587_v28, %v6260_v50  ;;  %v1590_v22 = vsel %vm1579_vm15, nan, %v1589_v21  ;;  %vm1683_vm0 = vweird.f32 %v5162_v32  ;;  %v3680_v34 = vand.u32 3, %v6114_v13 }
 0x27c   :  { %v3585_v56 = vsel %vm3578_vm5, %v3581_v1, %v3584_v10  ;;  %4469 = vmatprep.mubr.msk.f32.mxu0 %vm1906_vm12, %v1590_v22  ;;  %vm1686_vm14 = vcmp.lt.s32.totalorder %v1685_v30, 2  ;;  %vm1687_vm1 = vcmp.eq.s32.totalorder %v1685_v30, 0  ;;  %vm1690_vm11 = vcmp.eq.s32.totalorder %v1685_v30, 2 }
 0x27d   :  { %v3586_v58 = vsel %vm1579_vm15, nan, %v3585_v56  ;;  %v1689_v25 = vsel %vm1687_vm1, %v6173_v23, %v1688_v31  ;;  %v1692_v50 = vsel %vm1690_vm11, %v1691_v27, %v6179_v4  ;;  %vm3681_vm6 = vcmp.lt.s32.totalorder %v3680_v34, 2 }
 0x27e   :  { %4525 = vmatprep.mubr.msk.f32.mxu1 %vm1906_vm12, %v3586_v58  ;;  %vm3682_vm8 = vcmp.eq.s32.totalorder %v3680_v34, 0  ;;  %v1693_v6 = vsel %vm1686_vm14, %v1689_v25, %v1692_v50  ;;  %vm3685_vm13 = vcmp.eq.s32.totalorder %v3680_v34, 2  ;;  %v1788_v13 = vadd.s32 3, %v6283_v17 }
 0x27f   :  { %v3684_v44 = vsel %vm3682_vm8, %v6173_v23, %v1688_v31  ;;  %v1694_v11 = vsel %vm1683_vm0, nan, %v1693_v6  ;;  %v3687_v45 = vsel %vm3685_vm13, %v1691_v27, %v6179_v4  ;;  %v1792_v7 = vxor.u32 2147483648, %v6411_v39 }
 0x280   :  { %v1795_v26 = vxor.u32 2147483648, %v6395_v46  ;;  %4470 = vmatmul.mubr.msk.f32.gmra.mrb[28].mxu0 %vm1906_vm12, %v1694_v11  ;;  %v3688_v63 = vsel %vm3681_vm6, %v3684_v44, %v3687_v45  ;;  %vm1787_vm3 = vweird.f32 %v5448_v3  ;;  %v1789_v15 = vand.u32 3, %v1788_v13 }
 0x281   :  { %v3783_v23 = vand.u32 3, %v6283_v17  ;;  %v3689_v53 = vsel %vm1683_vm0, nan, %v3688_v63  ;;  %v1892_v48 = vadd.s32 3, %v6189_v47  ;;  %v1896_v35 = vxor.u32 2147483648, %v6383_v54 }
 0x282   :  { %v1899_v4 = vxor.u32 2147483648, %v6330_v33  ;;  %4526 = vmatmul.mubr.msk.f32.gmra.mrb[12].mxu1 %vm1906_vm12, %v3689_v53  ;;  %vm1790_vm15 = vcmp.lt.s32.totalorder %v1789_v15, 2  ;;  %vm1791_vm2 = vcmp.eq.s32.totalorder %v1789_v15, 0  ;;  %vm1794_vm4 = vcmp.eq.s32.totalorder %v1789_v15, 2 }
 0x283   :  { %vm3784_vm10 = vcmp.lt.s32.totalorder %v3783_v23, 2  ;;  %v1793_v43 = vsel %vm1791_vm2, %v6395_v46, %v1792_v7  ;;  %v1796_v8 = vsel %vm1794_vm4, %v1795_v26, %v6411_v39  ;;  %vm3785_vm5 = vcmp.eq.s32.totalorder %v3783_v23, 0 }
 0x284   :  { %vm3788_vm7 = vcmp.eq.s32.totalorder %v3783_v23, 2  ;;  %v1797_v32 = vsel %vm1790_vm15, %v1793_v43, %v1796_v8  ;;  %v3787_v17 = vsel %vm3785_vm5, %v6395_v46, %v1792_v7  ;;  %v1893_v5 = vand.u32 3, %v1892_v48 }
 0x285   :  { %v3790_v40 = vsel %vm3788_vm7, %v1795_v26, %v6411_v39  ;;  %v1798_v9 = vsel %vm1787_vm3, nan, %v1797_v32  ;;  %v3886_v20 = vand.u32 3, %v6189_v47  ;;  %vm1891_vm11 = vweird.f32 %v5344_v16  ;;  %v6516_v16 = vld [vmem:[%s6603_s5] ss:$0 sm:$0xff] }
 0x286   :  { %v3791_v12 = vsel %vm3784_vm10, %v3787_v17, %v3790_v40  ;;  %4472 = vmatprep.mubr.msk.f32.mxu0 %vm1906_vm12, %v1798_v9  ;;  %vm1895_vm9 = vcmp.eq.s32.totalorder %v1893_v5, 0  ;;  %vm1898_vm0 = vcmp.eq.s32.totalorder %v1893_v5, 2  ;;  %vm1894_vm14 = vcmp.lt.s32.totalorder %v1893_v5, 2 }
 0x287   :  { %v3792_v36 = vsel %vm1787_vm3, nan, %v3791_v12  ;;  %v1897_v46 = vsel %vm1895_vm9, %v6330_v33, %v1896_v35  ;;  %v1900_v39 = vsel %vm1898_vm0, %v1899_v4, %v6383_v54  ;;  %vm3888_vm1 = vcmp.eq.s32.totalorder %v3886_v20, 0 }
 0x288   :  { %4528 = vmatprep.mubr.msk.f32.mxu1 %vm1906_vm12, %v3792_v36  ;;  %v1901_v52 = vsel %vm1894_vm14, %v1897_v46, %v1900_v39  ;;  %v3890_v47 = vsel %vm3888_vm1, %v6330_v33, %v1896_v35  ;;  %vm3891_vm6 = vcmp.eq.s32.totalorder %v3886_v20, 2  ;;  %vm3887_vm8 = vcmp.lt.s32.totalorder %v3886_v20, 2 }
 0x289   :  { %v1902_v55 = vsel %vm1891_vm11, nan, %v1901_v52  ;;  %v3893_v3 = vsel %vm3891_vm6, %v1899_v4, %v6383_v54  ;;  %vm4131_vm13 = vcmask 261120  }
 0x28a   :  { %4473 = vmatmul.mubr.msk.f32.gmra.mrb[30].mxu0 %vm1906_vm12, %v1902_v55  ;;  %v3894_v49 = vsel %vm3887_vm8, %v3890_v47, %v3893_v3 }
 0x28b   :  { %v3895_v41 = vsel %vm1891_vm11, nan, %v3894_v49 }
 0x28c   :  { %4529 = vmatmul.mubr.msk.f32.gmra.mrb[14].mxu1 %vm1906_vm12, %v3895_v41 }
 0x30e   :  { %v4453_v18 = vpop.f32.mrb[16].mxu0 }
 0x30f   :  { %v2021_v51 = vpop.f32.mrb[17].mxu0 }
 0x310   :  { %v4509_v2 = vpop.f32.mrb[0].mxu1 }
 0x311   :  { %v4539_v33 = vadd.f32 %v4509_v2, %v4453_v18  ;;  %v4013_v60 = vpop.f32.mrb[1].mxu1 }
 0x312   :  { %v4540_v0 = vadd.f32 %v4013_v60, %v2021_v51 }
 0x313   :  { %v4116_v54 = vadd.f32 %v4539_v33, %v6516_v16 }
 0x314   :  { %v4115_v38 = vadd.f32 %v4540_v0, %v6516_v16 }
 0x315   :  { %4133 = vst.msk [vmem:[%s6604_s6 + $0x8] sm:$0xff] %vm4131_vm13, %v4116_v54 }
 0x316   :  { %4132 = vst.msk [vmem:[%s6604_s6] sm:$0xff] %vm4131_vm13, %v4115_v38 }
 0x31e   :  { %v4456_v61 = vpop.f32.mrb[18].mxu0 }
 0x31f   :  { %v2031_v59 = vpop.f32.mrb[19].mxu0  ;;  %v4512_v29 = vpop.f32.mrb[2].mxu1 }
 0x320   :  { %v4541_v28 = vadd.f32 %v4512_v29, %v4456_v61  ;;  %v4023_v62 = vpop.f32.mrb[3].mxu1 }
 0x321   :  { %v4542_v19 = vadd.f32 %v4023_v62, %v2031_v59 }
 0x322   :  { %v4118_v37 = vadd.f32 %v4541_v28, %v6516_v16 }
 0x323   :  { %v4117_v42 = vadd.f32 %v4542_v19, %v6516_v16 }
 0x324   :  { %4135 = vst.msk [vmem:[%s6604_s6 + $0x18] sm:$0xff] %vm4131_vm13, %v4118_v37 }
 0x325   :  { %4134 = vst.msk [vmem:[%s6604_s6 + $0x10] sm:$0xff] %vm4131_vm13, %v4117_v42 }
 0x32a   :  { %v4459_v24 = vpop.f32.mrb[20].mxu0 }
 0x32b   :  { %v2041_v31 = vpop.f32.mrb[21].mxu0  ;;  %v4515_v27 = vpop.f32.mrb[4].mxu1 }
 0x32c   :  { %v4543_v14 = vadd.f32 %v4515_v27, %v4459_v24  ;;  %v4033_v57 = vpop.f32.mrb[5].mxu1 }
 0x32d   :  { %v4544_v21 = vadd.f32 %v4033_v57, %v2041_v31 }
 0x32e   :  { %v4120_v1 = vadd.f32 %v4543_v14, %v6516_v16 }
 0x32f   :  { %v4119_v10 = vadd.f32 %v4544_v21, %v6516_v16 }
 0x330   :  { %4137 = vst.msk [vmem:[%s6604_s6 + $0x28] sm:$0xff] %vm4131_vm13, %v4120_v1 }
 0x331   :  { %4136 = vst.msk [vmem:[%s6604_s6 + $0x20] sm:$0xff] %vm4131_vm13, %v4119_v10 }
 0x336   :  { %v4462_v30 = vpop.f32.mrb[22].mxu0 }
 0x337   :  { %v2051_v22 = vpop.f32.mrb[23].mxu0  ;;  %v4518_v56 = vpop.f32.mrb[6].mxu1 }
 0x338   :  { %v4545_v34 = vadd.f32 %v4518_v56, %v4462_v30  ;;  %v4043_v58 = vpop.f32.mrb[7].mxu1 }
 0x339   :  { %v4546_v25 = vadd.f32 %v4043_v58, %v2051_v22 }
 0x33a   :  { %v4122_v50 = vadd.f32 %v4545_v34, %v6516_v16 }
 0x33b   :  { %v4121_v6 = vadd.f32 %v4546_v25, %v6516_v16 }
 0x33c   :  { %4139 = vst.msk [vmem:[%s6604_s6 + $0x38] sm:$0xff] %vm4131_vm13, %v4122_v50 }
 0x33d   :  { %4138 = vst.msk [vmem:[%s6604_s6 + $0x30] sm:$0xff] %vm4131_vm13, %v4121_v6 }
 0x33f   :  { %v4465_v44 = vpop.f32.mrb[24].mxu0 }
 0x340   :  { %v2061_v13 = vpop.f32.mrb[25].mxu0 }
 0x341   :  { %v4521_v11 = vpop.f32.mrb[8].mxu1 }
 0x342   :  { %v4547_v45 = vadd.f32 %v4521_v11, %v4465_v44  ;;  %v4053_v7 = vpop.f32.mrb[9].mxu1 }
 0x343   :  { %v4548_v26 = vadd.f32 %v4053_v7, %v2061_v13 }
 0x344   :  { %v4124_v63 = vadd.f32 %v4547_v45, %v6516_v16 }
 0x345   :  { %v4123_v15 = vadd.f32 %v4548_v26, %v6516_v16 }
 0x346   :  { %4141 = vst.msk [vmem:[%s6604_s6 + $0x48] sm:$0xff] %vm4131_vm13, %v4124_v63 }
 0x347   :  { %4140 = vst.msk [vmem:[%s6604_s6 + $0x40] sm:$0xff] %vm4131_vm13, %v4123_v15 }
 0x349   :  { %v4468_v23 = vpop.f32.mrb[26].mxu0 }
 0x34a   :  { %v2071_v53 = vpop.f32.mrb[27].mxu0 }
 0x34b   :  { %v4524_v48 = vpop.f32.mrb[10].mxu1 }
 0x34c   :  { %v4549_v35 = vadd.f32 %v4524_v48, %v4468_v23  ;;  %v4063_v4 = vpop.f32.mrb[11].mxu1 }
 0x34d   :  { %v4550_v43 = vadd.f32 %v4063_v4, %v2071_v53 }
 0x34e   :  { %v4126_v8 = vadd.f32 %v4549_v35, %v6516_v16 }
 0x34f   :  { %v4125_v32 = vadd.f32 %v4550_v43, %v6516_v16 }
 0x350   :  { %4143 = vst.msk [vmem:[%s6604_s6 + $0x58] sm:$0xff] %vm4131_vm13, %v4126_v8 }
 0x351   :  { %4142 = vst.msk [vmem:[%s6604_s6 + $0x50] sm:$0xff] %vm4131_vm13, %v4125_v32 }
 0x353   :  { %v4471_v17 = vpop.f32.mrb[28].mxu0 }
 0x354   :  { %v2081_v40 = vpop.f32.mrb[29].mxu0 }
 0x355   :  { %v4527_v5 = vpop.f32.mrb[12].mxu1 }
 0x356   :  { %v4551_v9 = vadd.f32 %v4527_v5, %v4471_v17  ;;  %v4073_v12 = vpop.f32.mrb[13].mxu1 }
 0x357   :  { %v4552_v20 = vadd.f32 %v4073_v12, %v2081_v40 }
 0x358   :  { %v4128_v36 = vadd.f32 %v4551_v9, %v6516_v16 }
 0x359   :  { %v4127_v46 = vadd.f32 %v4552_v20, %v6516_v16 }
 0x35a   :  { %4145 = vst.msk [vmem:[%s6604_s6 + $0x68] sm:$0xff] %vm4131_vm13, %v4128_v36 }
 0x35b   :  { %4144 = vst.msk [vmem:[%s6604_s6 + $0x60] sm:$0xff] %vm4131_vm13, %v4127_v46 }
 0x35d   :  { %v4474_v39 = vpop.f32.mrb[30].mxu0 }
 0x35e   :  { %v2091_v52 = vpop.f32.mrb[31].mxu0 }
 0x35f   :  { %v4530_v47 = vpop.f32.mrb[14].mxu1 }
 0x360   :  { %v4553_v55 = vadd.f32 %v4530_v47, %v4474_v39  ;;  %v4083_v3 = vpop.f32.mrb[15].mxu1 }
 0x361   :  { %v4554_v49 = vadd.f32 %v4083_v3, %v2091_v52 }
 0x362   :  { %v4130_v41 = vadd.f32 %v4553_v55, %v6516_v16 }
 0x363   :  { %v4129_v18 = vadd.f32 %v4554_v49, %v6516_v16 }
 0x364   :  { %4147 = vst.msk [vmem:[%s6604_s6 + $0x78] sm:$0xff] %vm4131_vm13, %v4130_v41 }
 0x365   :  { %4146 = vst.msk [vmem:[%s6604_s6 + $0x70] sm:$0xff] %vm4131_vm13, %v4129_v18 }

</bundles_post_ra>
